<compile_context>
chip_gen: v5e
topology: v5e:2x2
jax: 0.10.0
libtpu: 0.0.40
codegen_flags: <defaults>
</compile_context>

<pallas_src>
import math

import numpy as np
import jax
import jax.numpy as jnp
from jax.experimental import pallas as pl
from jax.experimental.pallas import tpu as pltpu

MXU_DTYPE = jnp.bfloat16   # MXU operand dtype (f32 accumulation); jnp.float32 for exactness.


# ---------------------------------------------------------------------------
# Host-side (numpy) operator builders.
# Activation layout everywhere:  A[b*H + i, c*W + j] == x[b, c, i, j]
# ---------------------------------------------------------------------------
def _bilinear_1d(n_in, n_out):
    """PyTorch Upsample(mode='bilinear', align_corners=False) 1-D weights."""
    U = np.zeros((n_out, n_in), np.float32)
    scale = n_in / n_out
    for i in range(n_out):
        src = max((i + 0.5) * scale - 0.5, 0.0)
        i0 = min(int(math.floor(src)), n_in - 1)
        i1 = min(i0 + 1, n_in - 1)
        frac = src - i0
        U[i, i0] += 1.0 - frac
        U[i, i1] += frac
    return U


def _conv_col(K, W, ky):
    """(Cin*W, Cout*W) banded width-tap matrix for kernel row ky (0,1,2)."""
    Cout, Cin, _, _ = K.shape
    M = np.zeros((Cin * W, Cout * W), np.float32)
    for co in range(Cout):
        for ci in range(Cin):
            for jout in range(W):
                for kx in range(3):
                    jin = jout + kx - 1
                    if 0 <= jin < W:
                        M[ci * W + jin, co * W + jout] += K[co, ci, ky, kx]
    return M


def _conv_fused(K, W):
    """vstack([center(ky=1), up-source(ky=0), down-source(ky=2)]) to pair with
    the lane-concatenated lhs [h | h(r-1) | h(r+1)]."""
    return np.concatenate([_conv_col(K, W, 1), _conv_col(K, W, 0), _conv_col(K, W, 2)], axis=0)


def _keep_masks(B, H, L):
    """0/1 masks zeroing rows whose +-1 row neighbour crosses an image boundary."""
    R = B * H
    mt = np.ones((R, L), np.float32)   # multiplies the h(r-1) view
    mb = np.ones((R, L), np.float32)   # multiplies the h(r+1) view
    for b in range(B):
        mt[b * H, :] = 0.0
        mb[b * H + H - 1, :] = 0.0
    return mt, mb


def _pool_row_even(B, H):
    """(B*H/2, B*H) selector of even rows (applied after max with the r+1 view)."""
    H2 = H // 2
    G = np.zeros((B * H2, B * H), np.float32)
    for b in range(B):
        for i in range(H2):
            G[b * H2 + i, b * H + 2 * i] = 1.0
    return G


def _pool_col_cat(C, W):
    """(C*W, 2*C*W/2): [even-col selector | odd-col selector]; halves are max-ed on VPU."""
    W2 = W // 2
    G = np.zeros((C * W, 2 * C * W2), np.float32)
    for c in range(C):
        for j in range(W2):
            G[c * W + 2 * j, c * W2 + j] = 1.0
            G[c * W + 2 * j + 1, C * W2 + c * W2 + j] = 1.0
    return G


def _up_row(B, H):
    U = _bilinear_1d(H, 2 * H)
    R = np.zeros((B * 2 * H, B * H), np.float32)
    for b in range(B):
        R[b * 2 * H:(b + 1) * 2 * H, b * H:(b + 1) * H] = U
    return R


def _up_col(C, W):
    U = _bilinear_1d(W, 2 * W)
    M = np.zeros((C * W, C * 2 * W), np.float32)
    for c in range(C):
        M[c * W:(c + 1) * W, c * 2 * W:(c + 1) * 2 * W] = U.T
    return M


def _enc_fc_stacked(Wenc, C4, H8, W8):
    """(H8*C4*W8, code): rows ordered to match the lane-concat of row-shifted views."""
    code = Wenc.shape[0]
    Wst = np.zeros((H8 * C4 * W8, code), np.float32)
    for s in range(H8):
        for c in range(C4):
            for w in range(W8):
                Wst[s * C4 * W8 + c * W8 + w, :] = Wenc[:, c * H8 * W8 + s * W8 + w]
    return Wst


def _bridge(B, H8, X8):
    """(B*X8, B*H8): selects row b*H8 of code_fat and broadcasts it to the X8
    decoder rows of image b (fuses the encoder row-select and decoder broadcast)."""
    M = np.zeros((B * X8, B * H8), np.float32)
    for b in range(B):
        for i in range(X8):
            M[b * X8 + i, b * H8] = 1.0
    return M


def _dec_fc_cat(Wdec, C4, X8, Y8):
    """(code, X8*C4*Y8): lane block i holds the decoder-FC weights of output row i."""
    code = Wdec.shape[1]
    Wc = np.zeros((code, X8 * C4 * Y8), np.float32)
    for i in range(X8):
        for c in range(C4):
            for j in range(Y8):
                Wc[:, i * C4 * Y8 + c * Y8 + j] = Wdec[c * X8 * Y8 + i * Y8 + j, :]
    return Wc


def _dsel_mask(B, X8, CY, i):
    M = np.zeros((B * X8, CY), np.float32)
    for b in range(B):
        M[b * X8 + i, :] = 1.0
    return M


class _Slab:
    """Packs many small 2-D constants into one lane-dense (rows, 128) slab,
    each entry row-aligned so in-kernel static slices are tile-aligned."""

    def __init__(self, lanes, dtype, align):
        self.lanes, self.dtype, self.align = lanes, dtype, align
        self.chunks, self.meta, self.off = [], {}, 0

    def add(self, name, arr):
        arr = np.asarray(arr, np.float32)
        if arr.ndim == 1:
            arr = arr[None, :]
        r, c = arr.shape
        assert c <= self.lanes, (name, arr.shape)
        buf = np.zeros((r, self.lanes), np.float32)
        buf[:, :c] = arr
        self.meta[name] = (self.off, r, c)
        self.chunks.append(buf)
        pad = (-r) % self.align
        if pad:
            self.chunks.append(np.zeros((pad, self.lanes), np.float32))
        self.off += r + pad

    def finalize(self):
        slab = np.concatenate(self.chunks, axis=0)
        return jnp.asarray(slab, dtype=self.dtype), dict(self.meta)


# ---------------------------------------------------------------------------
# Fused forward builder
# ---------------------------------------------------------------------------
def build_split_autoencoder(params, *, input_shape, conv_scale, code_size, batch,
                            mxu_dtype=MXU_DTYPE):
    y_dim, x_dim = int(input_shape[0]), int(input_shape[1])
    B = int(batch)
    C1, C2, C4 = conv_scale, 2 * conv_scale, 4 * conv_scale
    H8, W8 = y_dim // 8, x_dim // 8          # encoder CNN output spatial (h, w)
    X8, Y8 = x_dim // 8, y_dim // 8          # decoder Unflatten spatial (h, w)
    CY = C4 * Y8

    wsl = _Slab(128, mxu_dtype, align=16)    # bf16 native tile is (16, 128)
    fsl = _Slab(128, jnp.float32, align=8)
    shift_uses = []                          # (rows, cols) windows using the shift scratch

    # ---------------- encoder: (conv3x3 + relu + maxpool2) x 3 ----------------
    enc_tags = []
    H, W = y_dim, x_dim
    for tag, cin, cout, wn, bn in (("ec1", 1,  C1, "econv1_w", "econv1_b"),
                                   ("ec2", C1, C2, "econv2_w", "econv2_b"),
                                   ("ec3", C2, C4, "econv3_w", "econv3_b")):
        K = np.asarray(params[wn], np.float32)
        bias = np.asarray(params[bn], np.float32)
        wsl.add(tag + "_M", _conv_fused(K, W))
        fsl.add(tag + "_b", np.repeat(bias, W)[None, :])
        mt, mb = _keep_masks(B, H, cin * W)
        fsl.add(tag + "_mt", mt)
        fsl.add(tag + "_mb", mb)
        shift_uses.append((B * H, cin * W))

        ptag = "ep" + tag[2]
        wsl.add(ptag + "_Gr", _pool_row_even(B, H))
        wsl.add(ptag + "_Gc", _pool_col_cat(cout, W))
        shift_uses.append((B * H, cout * W))

        enc_tags.append((tag, ptag))
        H, W = H // 2, W // 2
    assert (H, W) == (H8, W8)

    # ---------------- encoder fc (Flatten + Linear) ----------------------------
    wsl.add("efc_W", _enc_fc_stacked(np.asarray(params["enc_fc_w"], np.float32), C4, H8, W8))
    fsl.add("efc_b", np.asarray(params["enc_fc_b"], np.float32)[None, :])
    shift_uses.append((B * H8, C4 * W8))

    # ---------------- decoder fc (Linear + Unflatten) --------------------------
    wsl.add("bridge", _bridge(B, H8, X8))
    wsl.add("dfc_W", _dec_fc_cat(np.asarray(params["dec_fc_w"], np.float32), C4, X8, Y8))
    for i in range(X8):
        fsl.add(f"dsel_{i}", _dsel_mask(B, X8, CY, i))
    bdec = np.asarray(params["dec_fc_b"], np.float32)
    b2d = np.zeros((B * X8, CY), np.float32)
    for b in range(B):
        for i in range(X8):
            for c in range(C4):
                for j in range(Y8):
                    b2d[b * X8 + i, c * Y8 + j] = bdec[c * X8 * Y8 + i * Y8 + j]
    fsl.add("dfc_b2d", b2d)

    # ---------------- decoder: (conv3x3 + relu + upsample2x) x 3 ---------------
    dec_tags = []
    H, W = X8, Y8
    for tag, cin, cout, wn, bn in (("dc3", C4, C2, "dconv3_w", "dconv3_b"),
                                   ("dc2", C2, C1, "dconv2_w", "dconv2_b"),
                                   ("dc1", C1, 1,  "dconv1_w", "dconv1_b")):
        K = np.asarray(params[wn], np.float32)
        bias = np.asarray(params[bn], np.float32)
        wsl.add(tag + "_M", _conv_fused(K, W))
        fsl.add(tag + "_b", np.repeat(bias, W)[None, :])
        mt, mb = _keep_masks(B, H, cin * W)
        fsl.add(tag + "_mt", mt)
        fsl.add(tag + "_mb", mb)
        shift_uses.append((B * H, cin * W))

        utag = "du" + tag[2]
        wsl.add(utag + "_R", _up_row(B, H))
        wsl.add(utag + "_C", _up_col(cout, W))

        dec_tags.append((tag, utag))
        H, W = 2 * H, 2 * W

    out_rows, out_cols = B * H, W            # == (B * x_dim, y_dim); channels == 1

    wslab, wmeta = wsl.finalize()
    fslab, fmeta = fsl.finalize()

    # Shift scratch: 8 zero rows on top, activation at [8, 8+R), zero pad below.
    SCR_R = 8 + max(r for r, _ in shift_uses) + max(8, H8)
    SCR_L = max(c for _, c in shift_uses)

    # ---------------------------- the fused kernel -----------------------------
    def kernel(x_ref, w_ref, f_ref, o_ref, hbuf):
        def getw(name):
            off, r, c = wmeta[name]
            return w_ref[off:off + r, 0:c]

        def getf(name):
            off, r, c = fmeta[name]
            return f_ref[off:off + r, 0:c]

        def dot(a, b):                      # MXU matmul with f32 accumulation
            return jnp.dot(a, b, preferred_element_type=jnp.float32)

        zeros_full = jnp.zeros((SCR_R, SCR_L), jnp.float32)   # hoisted (no CSE in loops)

        def stash(h):
            """Park h in the shift scratch so +-k row-shifted views are cheap ref reads."""
            R, L = h.shape
            hbuf[...] = zeros_full
            hbuf[8:8 + R, 0:L] = h
            return R, L

        def view(shift, R, L):              # rows r -> h[r + shift]; zero outside the image stack
            return hbuf[8 + shift:8 + shift + R, 0:L]

        def conv3x3_relu(h, tag):
            R, L = stash(h)
            up = view(-1, R, L) * getf(tag + "_mt")
            dn = view(+1, R, L) * getf(tag + "_mb")
            lhs = jnp.concatenate([h, up, dn], axis=1).astype(mxu_dtype)
            acc = dot(lhs, getw(tag + "_M")) + getf(tag + "_b")
            return jnp.maximum(acc, 0.0)    # Dropout2d(p=0) is the identity

        def maxpool2(h, ptag):
            R, L = stash(h)
            rowmax = jnp.maximum(h, view(+1, R, L)).astype(mxu_dtype)
            g = dot(getw(ptag + "_Gr"), rowmax)            # even-row select
            cc = dot(g.astype(mxu_dtype), getw(ptag + "_Gc"))   # [even cols | odd cols]
            half = cc.shape[1] // 2
            return jnp.maximum(cc[:, :half], cc[:, half:])

        def upsample2x(h, utag):
            t = dot(getw(utag + "_R"), h.astype(mxu_dtype))
            return dot(t.astype(mxu_dtype), getw(utag + "_C"))

        # ----- encoder -----
        h = x_ref[...].astype(jnp.float32)
        for tag, ptag in enc_tags:
            h = conv3x3_relu(h, tag)
            h = maxpool2(h, ptag)

        # Flatten + Linear: lane-concat of row-shifted views -> one K = H8*C4*W8 matmul.
        R, L = stash(h)
        pieces = [h] + [view(s, R, L) for s in range(1, H8)]
        lhs = (jnp.concatenate(pieces, axis=1) if H8 > 1 else h).astype(mxu_dtype)
        code_fat = dot(lhs, getw("efc_W"))                       # rows b*H8 hold code[b]
        code_b = dot(getw("bridge"), code_fat.astype(mxu_dtype)) + getf("efc_b")

        # ----- decoder fc + Unflatten + Sigmoid -----
        dwide = dot(code_b.astype(mxu_dtype), getw("dfc_W"))     # (B*X8, X8*C4*Y8)
        d = dwide[:, 0:CY] * getf("dsel_0")
        for i in range(1, X8):
            d = d + dwide[:, i * CY:(i + 1) * CY] * getf(f"dsel_{i}")
        d = d + getf("dfc_b2d")
        d = 1.0 / (1.0 + jnp.exp(-d))                            # exact sigmoid (EUP)

        # ----- decoder conv / upsample stack -----
        for tag, utag in dec_tags:
            d = conv3x3_relu(d, tag)
            d = upsample2x(d, utag)

        o_ref[...] = d.astype(o_ref.dtype)

    call = pl.pallas_call(
        kernel,
        out_shape=jax.ShapeDtypeStruct((out_rows, out_cols), jnp.float32),
        grid=(1,),
        in_specs=[
            pl.BlockSpec((B * y_dim, x_dim), lambda i: (0, 0)),
            pl.BlockSpec(tuple(wslab.shape), lambda i: (0, 0)),
            pl.BlockSpec(tuple(fslab.shape), lambda i: (0, 0)),
        ],
        out_specs=pl.BlockSpec((out_rows, out_cols), lambda i: (0, 0)),
        scratch_shapes=[pltpu.VMEM((SCR_R, SCR_L), jnp.float32)],
        compiler_params=pltpu.CompilerParams(
            dimension_semantics=("arbitrary",),
            vmem_limit_bytes=32 * 1024 * 1024),
    )

    @jax.jit
    def forward(x_nchw):
        # (B, 1, y, x) NCHW -> layout (B*y, x): free reshape (single channel).
        x2d = x_nchw.reshape(B * y_dim, x_dim).astype(jnp.float32)
        out2d = call(x2d, wslab, fslab)
        # decoder output layout (B*x, y) -> PyTorch (B, 1, x, y): free reshape.
        return out2d.reshape(B, 1, x_dim, y_dim)

    return forward


# ---------------------------------------------------------------------------
# Pure-JAX reference of the PyTorch module (f32) for in-script verification.
# ---------------------------------------------------------------------------
def reference_forward(params, x, *, input_shape, conv_scale):
    y_dim, x_dim = input_shape
    C4 = 4 * conv_scale
    X8, Y8 = x_dim // 8, y_dim // 8
    f32 = jnp.float32

    def conv(h, w, b):
        out = jax.lax.conv_general_dilated(
            h, jnp.asarray(w, f32), window_strides=(1, 1), padding="SAME",
            dimension_numbers=("NCHW", "OIHW", "NCHW"))
        return out + jnp.asarray(b, f32)[None, :, None, None]

    def pool(h):
        return jax.lax.reduce_window(h, -jnp.inf, jax.lax.max,
                                     (1, 1, 2, 2), (1, 1, 2, 2), "VALID")

    def up(h):
        _, _, hh, ww = h.shape
        Uh = jnp.asarray(_bilinear_1d(hh, 2 * hh), f32)
        Uw = jnp.asarray(_bilinear_1d(ww, 2 * ww), f32)
        return jnp.einsum("ph,bchw,qw->bcpq", Uh, h, Uw)

    relu = jax.nn.relu
    h = x.astype(f32)
    h = pool(relu(conv(h, params["econv1_w"], params["econv1_b"])))
    h = pool(relu(conv(h, params["econv2_w"], params["econv2_b"])))
    h = pool(relu(conv(h, params["econv3_w"], params["econv3_b"])))
    code = h.reshape(h.shape[0], -1) @ jnp.asarray(params["enc_fc_w"], f32).T \
        + jnp.asarray(params["enc_fc_b"], f32)
    d = code @ jnp.asarray(params["dec_fc_w"], f32).T + jnp.asarray(params["dec_fc_b"], f32)
    d = jax.nn.sigmoid(d).reshape(-1, C4, X8, Y8)
    d = up(relu(conv(d, params["dconv3_w"], params["dconv3_b"])))
    d = up(relu(conv(d, params["dconv2_w"], params["dconv2_b"])))
    d = up(relu(conv(d, params["dconv1_w"], params["dconv1_b"])))
    return d


# ---------------------------------------------------------------------------
# Deterministic synthetic parameters (PyTorch-style uniform init bounds)
# ---------------------------------------------------------------------------
def init_params(key, *, input_shape, conv_scale, code_size):
    y_dim, x_dim = input_shape
    C1, C2, C4 = conv_scale, 2 * conv_scale, 4 * conv_scale
    F = (x_dim // 8) * (y_dim // 8) * C4
    ks = jax.random.split(key, 16)

    def u(k, shape, fan_in):
        bound = 1.0 / math.sqrt(fan_in)
        return jax.random.uniform(k, shape, jnp.float32, -bound, bound)

    return {
        "econv1_w": u(ks[0], (C1, 1, 3, 3), 1 * 9),    "econv1_b": u(ks[1], (C1,), 1 * 9),
        "econv2_w": u(ks[2], (C2, C1, 3, 3), C1 * 9),  "econv2_b": u(ks[3], (C2,), C1 * 9),
        "econv3_w": u(ks[4], (C4, C2, 3, 3), C2 * 9),  "econv3_b": u(ks[5], (C4,), C2 * 9),
        "enc_fc_w": u(ks[6], (code_size, F), F),       "enc_fc_b": u(ks[7], (code_size,), F),
        "dec_fc_w": u(ks[8], (F, code_size), code_size), "dec_fc_b": u(ks[9], (F,), code_size),
        "dconv3_w": u(ks[10], (C2, C4, 3, 3), C4 * 9), "dconv3_b": u(ks[11], (C2,), C4 * 9),
        "dconv2_w": u(ks[12], (C1, C2, 3, 3), C2 * 9), "dconv2_b": u(ks[13], (C1,), C2 * 9),
        "dconv1_w": u(ks[14], (1, C1, 3, 3), C1 * 9),  "dconv1_b": u(ks[15], (1,), C1 * 9),
    }


if __name__ == "__main__":
    # Small config consistent with the module: input_shape=(16,16),
    # convolutions=4, code_size=32, dropout_chance=0.0 (default), batch=2.
    # TODO(synk): train-mode Dropout2d (p>0) would need pltpu.prng_seed/prng_random_bits masks.
    input_shape = (16, 16)     # (y, x)
    conv_scale = 4
    code_size = 32
    B = 2

    key = jax.random.PRNGKey(0)
    pkey, dkey = jax.random.split(key)
    params = init_params(pkey, input_shape=input_shape,
                         conv_scale=conv_scale, code_size=code_size)
    forward = build_split_autoencoder(params, input_shape=input_shape,
                                      conv_scale=conv_scale,
                                      code_size=code_size, batch=B)

    x = jax.random.normal(dkey, (B, 1, input_shape[0], input_shape[1]), jnp.float32)
    out = jax.block_until_ready(forward(x))

    assert out.shape == (B, 1, input_shape[1], input_shape[0]), out.shape
    assert bool(jnp.all(jnp.isfinite(out)))

    ref = reference_forward(params, x, input_shape=input_shape, conv_scale=conv_scale)
    err = float(jnp.max(jnp.abs(out - ref)))
    # bf16 MXU operands + f32 accumulation -> ~1e-2-scale deviation expected.
    assert err < 1e-1, f"max |kernel - reference| = {err}"
    print("KERNEL_OK")
</pallas_src>

<mosaic_0001>
module attributes {stable_mosaic.version = 11 : i64} {
  func.func @kernel(%arg0: i32, %arg1: memref<32x16xf32, #tpu.memory_space<vmem>>, %arg2: memref<992x128xbf16, #tpu.memory_space<vmem>>, %arg3: memref<256x128xf32, #tpu.memory_space<vmem>>, %arg4: memref<32x16xf32, #tpu.memory_space<vmem>>, %arg5: memref<48x64xf32, #tpu.memory_space<vmem>>) attributes {dimension_semantics = [#tpu.dimension_semantics<arbitrary>], iteration_bounds = array<i64: 1>, scalar_prefetch = 0 : i64, scratch_operands = 1 : i64, tpu.core_type = #tpu.core_type<tc>, window_params = [{pipeline_mode = #tpu.pipeline_mode<synchronous>, transform_indices = @transform_0, window_bounds = array<i64: 32, 16>}, {pipeline_mode = #tpu.pipeline_mode<synchronous>, transform_indices = @transform_1, window_bounds = array<i64: 992, 128>}, {pipeline_mode = #tpu.pipeline_mode<synchronous>, transform_indices = @transform_2, window_bounds = array<i64: 256, 128>}, {pipeline_mode = #tpu.pipeline_mode<synchronous>, transform_indices = @transform_3, window_bounds = array<i64: 32, 16>}]} {
    %cst = arith.constant 0.000000e+00 : f32
    %0 = vector.broadcast %cst : f32 to vector<48x64xf32>
    %c0 = arith.constant 0 : index
    %c0_0 = arith.constant 0 : index
    %1 = vector.load %arg1[%c0, %c0_0] : memref<32x16xf32, #tpu.memory_space<vmem>>, vector<32x16xf32>
    %c0_1 = arith.constant 0 : index
    %c0_2 = arith.constant 0 : index
    %2 = vector.load %arg5[%c0_1, %c0_2] : memref<48x64xf32, #tpu.memory_space<vmem>>, vector<48x64xf32>
    tpu.vector_store %arg5[%c0_1, %c0_2], %0 {strides = array<i32>} : memref<48x64xf32, #tpu.memory_space<vmem>>, vector<48x64xf32>,
    %c8 = arith.constant 8 : index
    %c0_3 = arith.constant 0 : index
    %3 = vector.load %arg5[%c8, %c0_3] : memref<48x64xf32, #tpu.memory_space<vmem>>, vector<32x16xf32>
    tpu.vector_store %arg5[%c8, %c0_3], %1 {strides = array<i32>} : memref<48x64xf32, #tpu.memory_space<vmem>>, vector<32x16xf32>,
    %c7 = arith.constant 7 : index
    %c0_4 = arith.constant 0 : index
    %4 = vector.load %arg5[%c7, %c0_4] : memref<48x64xf32, #tpu.memory_space<vmem>>, vector<32x16xf32>
    %c8_5 = arith.constant 8 : index
    %c0_6 = arith.constant 0 : index
    %5 = vector.load %arg3[%c8_5, %c0_6] : memref<256x128xf32, #tpu.memory_space<vmem>>, vector<32x16xf32>
    %6 = arith.mulf %4, %5 : vector<32x16xf32>
    %c9 = arith.constant 9 : index
    %c0_7 = arith.constant 0 : index
    %7 = vector.load %arg5[%c9, %c0_7] : memref<48x64xf32, #tpu.memory_space<vmem>>, vector<32x16xf32>
    %c40 = arith.constant 40 : index
    %c0_8 = arith.constant 0 : index
    %8 = vector.load %arg3[%c40, %c0_8] : memref<256x128xf32, #tpu.memory_space<vmem>>, vector<32x16xf32>
    %9 = arith.mulf %7, %8 : vector<32x16xf32>
    %10 = tpu.concatenate %1, %6, %9 in 1 : vector<32x16xf32>, vector<32x16xf32>, vector<32x16xf32> -> vector<32x48xf32>
    %11 = arith.truncf %10 : vector<32x48xf32> to vector<32x48xbf16>
    %c0_9 = arith.constant 0 : index
    %c0_10 = arith.constant 0 : index
    %12 = vector.load %arg2[%c0_9, %c0_10] : memref<992x128xbf16, #tpu.memory_space<vmem>>, vector<48x64xbf16>
    %cst_11 = arith.constant dense<0.000000e+00> : vector<32x64xf32>
    %13 = tpu.matmul %11, %12, %cst_11 {dimension_numbers = #tpu.dot_dimension_numbers<[1], [0], [0], [1], [0, 0, 1, 1], [], []>} : vector<32x48xbf16>, vector<48x64xbf16>, vector<32x64xf32> -> vector<32x64xf32>
    %c0_12 = arith.constant 0 : index
    %c0_13 = arith.constant 0 : index
    %14 = vector.load %arg3[%c0_12, %c0_13] : memref<256x128xf32, #tpu.memory_space<vmem>>, vector<1x64xf32>
    %15 = vector.broadcast %14 : vector<1x64xf32> to vector<32x64xf32>
    %16 = arith.addf %13, %15 : vector<32x64xf32>
    %cst_14 = arith.constant 0.000000e+00 : f32
    %17 = vector.broadcast %cst_14 : f32 to vector<32x64xf32>
    %18 = arith.maximumf %16, %17 : vector<32x64xf32>
    %c0_15 = arith.constant 0 : index
    %c0_16 = arith.constant 0 : index
    %19 = vector.load %arg5[%c0_15, %c0_16] : memref<48x64xf32, #tpu.memory_space<vmem>>, vector<48x64xf32>
    tpu.vector_store %arg5[%c0_15, %c0_16], %0 {strides = array<i32>} : memref<48x64xf32, #tpu.memory_space<vmem>>, vector<48x64xf32>,
    %c8_17 = arith.constant 8 : index
    %c0_18 = arith.constant 0 : index
    %20 = vector.load %arg5[%c8_17, %c0_18] : memref<48x64xf32, #tpu.memory_space<vmem>>, vector<32x64xf32>
    tpu.vector_store %arg5[%c8_17, %c0_18], %18 {strides = array<i32>} : memref<48x64xf32, #tpu.memory_space<vmem>>, vector<32x64xf32>,
    %c9_19 = arith.constant 9 : index
    %c0_20 = arith.constant 0 : index
    %21 = vector.load %arg5[%c9_19, %c0_20] : memref<48x64xf32, #tpu.memory_space<vmem>>, vector<32x64xf32>
    %22 = arith.maximumf %18, %21 : vector<32x64xf32>
    %23 = arith.truncf %22 : vector<32x64xf32> to vector<32x64xbf16>
    %c48 = arith.constant 48 : index
    %c0_21 = arith.constant 0 : index
    %24 = vector.load %arg2[%c48, %c0_21] : memref<992x128xbf16, #tpu.memory_space<vmem>>, vector<16x32xbf16>
    %cst_22 = arith.constant dense<0.000000e+00> : vector<16x64xf32>
    %25 = tpu.matmul %24, %23, %cst_22 {dimension_numbers = #tpu.dot_dimension_numbers<[1], [0], [0], [1], [0, 0, 1, 1], [], []>} : vector<16x32xbf16>, vector<32x64xbf16>, vector<16x64xf32> -> vector<16x64xf32>
    %26 = arith.truncf %25 : vector<16x64xf32> to vector<16x64xbf16>
    %c64 = arith.constant 64 : index
    %c0_23 = arith.constant 0 : index
    %27 = vector.load %arg2[%c64, %c0_23] : memref<992x128xbf16, #tpu.memory_space<vmem>>, vector<64x64xbf16>
    %cst_24 = arith.constant dense<0.000000e+00> : vector<16x64xf32>
    %28 = tpu.matmul %26, %27, %cst_24 {dimension_numbers = #tpu.dot_dimension_numbers<[1], [0], [0], [1], [0, 0, 1, 1], [], []>} : vector<16x64xbf16>, vector<64x64xbf16>, vector<16x64xf32> -> vector<16x64xf32>
    %29 = vector.extract_strided_slice %28 {offsets = [0, 0], sizes = [16, 32], strides = [1, 1]} : vector<16x64xf32> to vector<16x32xf32>
    %30 = vector.extract_strided_slice %28 {offsets = [0, 32], sizes = [16, 32], strides = [1, 1]} : vector<16x64xf32> to vector<16x32xf32>
    %31 = arith.maximumf %29, %30 : vector<16x32xf32>
    %c0_25 = arith.constant 0 : index
    %c0_26 = arith.constant 0 : index
    %32 = vector.load %arg5[%c0_25, %c0_26] : memref<48x64xf32, #tpu.memory_space<vmem>>, vector<48x64xf32>
    tpu.vector_store %arg5[%c0_25, %c0_26], %0 {strides = array<i32>} : memref<48x64xf32, #tpu.memory_space<vmem>>, vector<48x64xf32>,
    %c8_27 = arith.constant 8 : index
    %c0_28 = arith.constant 0 : index
    %33 = vector.load %arg5[%c8_27, %c0_28] : memref<48x64xf32, #tpu.memory_space<vmem>>, vector<16x32xf32>
    tpu.vector_store %arg5[%c8_27, %c0_28], %31 {strides = array<i32>} : memref<48x64xf32, #tpu.memory_space<vmem>>, vector<16x32xf32>,
    %c7_29 = arith.constant 7 : index
    %c0_30 = arith.constant 0 : index
    %34 = vector.load %arg5[%c7_29, %c0_30] : memref<48x64xf32, #tpu.memory_space<vmem>>, vector<16x32xf32>
    %c80 = arith.constant 80 : index
    %c0_31 = arith.constant 0 : index
    %35 = vector.load %arg3[%c80, %c0_31] : memref<256x128xf32, #tpu.memory_space<vmem>>, vector<16x32xf32>
    %36 = arith.mulf %34, %35 : vector<16x32xf32>
    %c9_32 = arith.constant 9 : index
    %c0_33 = arith.constant 0 : index
    %37 = vector.load %arg5[%c9_32, %c0_33] : memref<48x64xf32, #tpu.memory_space<vmem>>, vector<16x32xf32>
    %c96 = arith.constant 96 : index
    %c0_34 = arith.constant 0 : index
    %38 = vector.load %arg3[%c96, %c0_34] : memref<256x128xf32, #tpu.memory_space<vmem>>, vector<16x32xf32>
    %39 = arith.mulf %37, %38 : vector<16x32xf32>
    %40 = tpu.concatenate %31, %36, %39 in 1 : vector<16x32xf32>, vector<16x32xf32>, vector<16x32xf32> -> vector<16x96xf32>
    %41 = arith.truncf %40 : vector<16x96xf32> to vector<16x96xbf16>
    %c128 = arith.constant 128 : index
    %c0_35 = arith.constant 0 : index
    %42 = vector.load %arg2[%c128, %c0_35] : memref<992x128xbf16, #tpu.memory_space<vmem>>, vector<96x64xbf16>
    %cst_36 = arith.constant dense<0.000000e+00> : vector<16x64xf32>
    %43 = tpu.matmul %41, %42, %cst_36 {dimension_numbers = #tpu.dot_dimension_numbers<[1], [0], [0], [1], [0, 0, 1, 1], [], []>} : vector<16x96xbf16>, vector<96x64xbf16>, vector<16x64xf32> -> vector<16x64xf32>
    %c72 = arith.constant 72 : index
    %c0_37 = arith.constant 0 : index
    %44 = vector.load %arg3[%c72, %c0_37] : memref<256x128xf32, #tpu.memory_space<vmem>>, vector<1x64xf32>
    %45 = vector.broadcast %44 : vector<1x64xf32> to vector<16x64xf32>
    %46 = arith.addf %43, %45 : vector<16x64xf32>
    %cst_38 = arith.constant 0.000000e+00 : f32
    %47 = vector.broadcast %cst_38 : f32 to vector<16x64xf32>
    %48 = arith.maximumf %46, %47 : vector<16x64xf32>
    %c0_39 = arith.constant 0 : index
    %c0_40 = arith.constant 0 : index
    %49 = vector.load %arg5[%c0_39, %c0_40] : memref<48x64xf32, #tpu.memory_space<vmem>>, vector<48x64xf32>
    tpu.vector_store %arg5[%c0_39, %c0_40], %0 {strides = array<i32>} : memref<48x64xf32, #tpu.memory_space<vmem>>, vector<48x64xf32>,
    %c8_41 = arith.constant 8 : index
    %c0_42 = arith.constant 0 : index
    %50 = vector.load %arg5[%c8_41, %c0_42] : memref<48x64xf32, #tpu.memory_space<vmem>>, vector<16x64xf32>
    tpu.vector_store %arg5[%c8_41, %c0_42], %48 {strides = array<i32>} : memref<48x64xf32, #tpu.memory_space<vmem>>, vector<16x64xf32>,
    %c9_43 = arith.constant 9 : index
    %c0_44 = arith.constant 0 : index
    %51 = vector.load %arg5[%c9_43, %c0_44] : memref<48x64xf32, #tpu.memory_space<vmem>>, vector<16x64xf32>
    %52 = arith.maximumf %48, %51 : vector<16x64xf32>
    %53 = arith.truncf %52 : vector<16x64xf32> to vector<16x64xbf16>
    %c224 = arith.constant 224 : index
    %c0_45 = arith.constant 0 : index
    %54 = vector.load %arg2[%c224, %c0_45] : memref<992x128xbf16, #tpu.memory_space<vmem>>, vector<8x16xbf16>
    %cst_46 = arith.constant dense<0.000000e+00> : vector<8x64xf32>
    %55 = tpu.matmul %54, %53, %cst_46 {dimension_numbers = #tpu.dot_dimension_numbers<[1], [0], [0], [1], [0, 0, 1, 1], [], []>} : vector<8x16xbf16>, vector<16x64xbf16>, vector<8x64xf32> -> vector<8x64xf32>
    %56 = arith.truncf %55 : vector<8x64xf32> to vector<8x64xbf16>
    %c240 = arith.constant 240 : index
    %c0_47 = arith.constant 0 : index
    %57 = vector.load %arg2[%c240, %c0_47] : memref<992x128xbf16, #tpu.memory_space<vmem>>, vector<64x64xbf16>
    %cst_48 = arith.constant dense<0.000000e+00> : vector<8x64xf32>
    %58 = tpu.matmul %56, %57, %cst_48 {dimension_numbers = #tpu.dot_dimension_numbers<[1], [0], [0], [1], [0, 0, 1, 1], [], []>} : vector<8x64xbf16>, vector<64x64xbf16>, vector<8x64xf32> -> vector<8x64xf32>
    %59 = vector.extract_strided_slice %58 {offsets = [0, 0], sizes = [8, 32], strides = [1, 1]} : vector<8x64xf32> to vector<8x32xf32>
    %60 = vector.extract_strided_slice %58 {offsets = [0, 32], sizes = [8, 32], strides = [1, 1]} : vector<8x64xf32> to vector<8x32xf32>
    %61 = arith.maximumf %59, %60 : vector<8x32xf32>
    %c0_49 = arith.constant 0 : index
    %c0_50 = arith.constant 0 : index
    %62 = vector.load %arg5[%c0_49, %c0_50] : memref<48x64xf32, #tpu.memory_space<vmem>>, vector<48x64xf32>
    tpu.vector_store %arg5[%c0_49, %c0_50], %0 {strides = array<i32>} : memref<48x64xf32, #tpu.memory_space<vmem>>, vector<48x64xf32>,
    %c8_51 = arith.constant 8 : index
    %c0_52 = arith.constant 0 : index
    %63 = vector.load %arg5[%c8_51, %c0_52] : memref<48x64xf32, #tpu.memory_space<vmem>>, vector<8x32xf32>
    tpu.vector_store %arg5[%c8_51, %c0_52], %61 {strides = array<i32>} : memref<48x64xf32, #tpu.memory_space<vmem>>, vector<8x32xf32>,
    %c7_53 = arith.constant 7 : index
    %c0_54 = arith.constant 0 : index
    %64 = vector.load %arg5[%c7_53, %c0_54] : memref<48x64xf32, #tpu.memory_space<vmem>>, vector<8x32xf32>
    %c120 = arith.constant 120 : index
    %c0_55 = arith.constant 0 : index
    %65 = vector.load %arg3[%c120, %c0_55] : memref<256x128xf32, #tpu.memory_space<vmem>>, vector<8x32xf32>
    %66 = arith.mulf %64, %65 : vector<8x32xf32>
    %c9_56 = arith.constant 9 : index
    %c0_57 = arith.constant 0 : index
    %67 = vector.load %arg5[%c9_56, %c0_57] : memref<48x64xf32, #tpu.memory_space<vmem>>, vector<8x32xf32>
    %c128_58 = arith.constant 128 : index
    %c0_59 = arith.constant 0 : index
    %68 = vector.load %arg3[%c128_58, %c0_59] : memref<256x128xf32, #tpu.memory_space<vmem>>, vector<8x32xf32>
    %69 = arith.mulf %67, %68 : vector<8x32xf32>
    %70 = tpu.concatenate %61, %66, %69 in 1 : vector<8x32xf32>, vector<8x32xf32>, vector<8x32xf32> -> vector<8x96xf32>
    %71 = arith.truncf %70 : vector<8x96xf32> to vector<8x96xbf16>
    %c304 = arith.constant 304 : index
    %c0_60 = arith.constant 0 : index
    %72 = vector.load %arg2[%c304, %c0_60] : memref<992x128xbf16, #tpu.memory_space<vmem>>, vector<96x64xbf16>
    %cst_61 = arith.constant dense<0.000000e+00> : vector<8x64xf32>
    %73 = tpu.matmul %71, %72, %cst_61 {dimension_numbers = #tpu.dot_dimension_numbers<[1], [0], [0], [1], [0, 0, 1, 1], [], []>} : vector<8x96xbf16>, vector<96x64xbf16>, vector<8x64xf32> -> vector<8x64xf32>
    %c112 = arith.constant 112 : index
    %c0_62 = arith.constant 0 : index
    %74 = vector.load %arg3[%c112, %c0_62] : memref<256x128xf32, #tpu.memory_space<vmem>>, vector<1x64xf32>
    %75 = vector.broadcast %74 : vector<1x64xf32> to vector<8x64xf32>
    %76 = arith.addf %73, %75 : vector<8x64xf32>
    %cst_63 = arith.constant 0.000000e+00 : f32
    %77 = vector.broadcast %cst_63 : f32 to vector<8x64xf32>
    %78 = arith.maximumf %76, %77 : vector<8x64xf32>
    %c0_64 = arith.constant 0 : index
    %c0_65 = arith.constant 0 : index
    %79 = vector.load %arg5[%c0_64, %c0_65] : memref<48x64xf32, #tpu.memory_space<vmem>>, vector<48x64xf32>
    tpu.vector_store %arg5[%c0_64, %c0_65], %0 {strides = array<i32>} : memref<48x64xf32, #tpu.memory_space<vmem>>, vector<48x64xf32>,
    %c8_66 = arith.constant 8 : index
    %c0_67 = arith.constant 0 : index
    %80 = vector.load %arg5[%c8_66, %c0_67] : memref<48x64xf32, #tpu.memory_space<vmem>>, vector<8x64xf32>
    tpu.vector_store %arg5[%c8_66, %c0_67], %78 {strides = array<i32>} : memref<48x64xf32, #tpu.memory_space<vmem>>, vector<8x64xf32>,
    %c9_68 = arith.constant 9 : index
    %c0_69 = arith.constant 0 : index
    %81 = vector.load %arg5[%c9_68, %c0_69] : memref<48x64xf32, #tpu.memory_space<vmem>>, vector<8x64xf32>
    %82 = arith.maximumf %78, %81 : vector<8x64xf32>
    %83 = arith.truncf %82 : vector<8x64xf32> to vector<8x64xbf16>
    %c400 = arith.constant 400 : index
    %c0_70 = arith.constant 0 : index
    %84 = vector.load %arg2[%c400, %c0_70] : memref<992x128xbf16, #tpu.memory_space<vmem>>, vector<4x8xbf16>
    %cst_71 = arith.constant dense<0.000000e+00> : vector<4x64xf32>
    %85 = tpu.matmul %84, %83, %cst_71 {dimension_numbers = #tpu.dot_dimension_numbers<[1], [0], [0], [1], [0, 0, 1, 1], [], []>} : vector<4x8xbf16>, vector<8x64xbf16>, vector<4x64xf32> -> vector<4x64xf32>
    %86 = arith.truncf %85 : vector<4x64xf32> to vector<4x64xbf16>
    %c416 = arith.constant 416 : index
    %c0_72 = arith.constant 0 : index
    %87 = vector.load %arg2[%c416, %c0_72] : memref<992x128xbf16, #tpu.memory_space<vmem>>, vector<64x64xbf16>
    %cst_73 = arith.constant dense<0.000000e+00> : vector<4x64xf32>
    %88 = tpu.matmul %86, %87, %cst_73 {dimension_numbers = #tpu.dot_dimension_numbers<[1], [0], [0], [1], [0, 0, 1, 1], [], []>} : vector<4x64xbf16>, vector<64x64xbf16>, vector<4x64xf32> -> vector<4x64xf32>
    %89 = vector.extract_strided_slice %88 {offsets = [0, 0], sizes = [4, 32], strides = [1, 1]} : vector<4x64xf32> to vector<4x32xf32>
    %90 = vector.extract_strided_slice %88 {offsets = [0, 32], sizes = [4, 32], strides = [1, 1]} : vector<4x64xf32> to vector<4x32xf32>
    %91 = arith.maximumf %89, %90 : vector<4x32xf32>
    %c0_74 = arith.constant 0 : index
    %c0_75 = arith.constant 0 : index
    %92 = vector.load %arg5[%c0_74, %c0_75] : memref<48x64xf32, #tpu.memory_space<vmem>>, vector<48x64xf32>
    tpu.vector_store %arg5[%c0_74, %c0_75], %0 {strides = array<i32>} : memref<48x64xf32, #tpu.memory_space<vmem>>, vector<48x64xf32>,
    %c8_76 = arith.constant 8 : index
    %c0_77 = arith.constant 0 : index
    %93 = vector.load %arg5[%c8_76, %c0_77] : memref<48x64xf32, #tpu.memory_space<vmem>>, vector<4x32xf32>
    tpu.vector_store %arg5[%c8_76, %c0_77], %91 {strides = array<i32>} : memref<48x64xf32, #tpu.memory_space<vmem>>, vector<4x32xf32>,
    %c9_78 = arith.constant 9 : index
    %c0_79 = arith.constant 0 : index
    %94 = vector.load %arg5[%c9_78, %c0_79] : memref<48x64xf32, #tpu.memory_space<vmem>>, vector<4x32xf32>
    %95 = tpu.concatenate %91, %94 in 1 : vector<4x32xf32>, vector<4x32xf32> -> vector<4x64xf32>
    %96 = arith.truncf %95 : vector<4x64xf32> to vector<4x64xbf16>
    %c480 = arith.constant 480 : index
    %c0_80 = arith.constant 0 : index
    %97 = vector.load %arg2[%c480, %c0_80] : memref<992x128xbf16, #tpu.memory_space<vmem>>, vector<64x32xbf16>
    %cst_81 = arith.constant dense<0.000000e+00> : vector<4x32xf32>
    %98 = tpu.matmul %96, %97, %cst_81 {dimension_numbers = #tpu.dot_dimension_numbers<[1], [0], [0], [1], [0, 0, 1, 1], [], []>} : vector<4x64xbf16>, vector<64x32xbf16>, vector<4x32xf32> -> vector<4x32xf32>
    %c544 = arith.constant 544 : index
    %c0_82 = arith.constant 0 : index
    %99 = vector.load %arg2[%c544, %c0_82] : memref<992x128xbf16, #tpu.memory_space<vmem>>, vector<4x4xbf16>
    %100 = arith.truncf %98 : vector<4x32xf32> to vector<4x32xbf16>
    %cst_83 = arith.constant dense<0.000000e+00> : vector<4x32xf32>
    %101 = tpu.matmul %99, %100, %cst_83 {dimension_numbers = #tpu.dot_dimension_numbers<[1], [0], [0], [1], [0, 0, 1, 1], [], []>} : vector<4x4xbf16>, vector<4x32xbf16>, vector<4x32xf32> -> vector<4x32xf32>
    %c136 = arith.constant 136 : index
    %c0_84 = arith.constant 0 : index
    %102 = vector.load %arg3[%c136, %c0_84] : memref<256x128xf32, #tpu.memory_space<vmem>>, vector<1x32xf32>
    %103 = vector.broadcast %102 : vector<1x32xf32> to vector<4x32xf32>
    %104 = arith.addf %101, %103 : vector<4x32xf32>
    %105 = arith.truncf %104 : vector<4x32xf32> to vector<4x32xbf16>
    %c560 = arith.constant 560 : index
    %c0_85 = arith.constant 0 : index
    %106 = vector.load %arg2[%c560, %c0_85] : memref<992x128xbf16, #tpu.memory_space<vmem>>, vector<32x64xbf16>
    %cst_86 = arith.constant dense<0.000000e+00> : vector<4x64xf32>
    %107 = tpu.matmul %105, %106, %cst_86 {dimension_numbers = #tpu.dot_dimension_numbers<[1], [0], [0], [1], [0, 0, 1, 1], [], []>} : vector<4x32xbf16>, vector<32x64xbf16>, vector<4x64xf32> -> vector<4x64xf32>
    %108 = vector.extract_strided_slice %107 {offsets = [0, 0], sizes = [4, 32], strides = [1, 1]} : vector<4x64xf32> to vector<4x32xf32>
    %c144 = arith.constant 144 : index
    %c0_87 = arith.constant 0 : index
    %109 = vector.load %arg3[%c144, %c0_87] : memref<256x128xf32, #tpu.memory_space<vmem>>, vector<4x32xf32>
    %110 = arith.mulf %108, %109 : vector<4x32xf32>
    %111 = vector.extract_strided_slice %107 {offsets = [0, 32], sizes = [4, 32], strides = [1, 1]} : vector<4x64xf32> to vector<4x32xf32>
    %c152 = arith.constant 152 : index
    %c0_88 = arith.constant 0 : index
    %112 = vector.load %arg3[%c152, %c0_88] : memref<256x128xf32, #tpu.memory_space<vmem>>, vector<4x32xf32>
    %113 = arith.mulf %111, %112 : vector<4x32xf32>
    %114 = arith.addf %110, %113 : vector<4x32xf32>
    %c160 = arith.constant 160 : index
    %c0_89 = arith.constant 0 : index
    %115 = vector.load %arg3[%c160, %c0_89] : memref<256x128xf32, #tpu.memory_space<vmem>>, vector<4x32xf32>
    %116 = arith.addf %114, %115 : vector<4x32xf32>
    %cst_90 = arith.constant 0.000000e+00 : f32
    %117 = vector.broadcast %cst_90 : f32 to vector<4x32xf32>
    %118 = arith.subf %117, %116 : vector<4x32xf32>
    %119 = math.exp %118 : vector<4x32xf32>
    %cst_91 = arith.constant 1.000000e+00 : f32
    %120 = vector.broadcast %cst_91 : f32 to vector<4x32xf32>
    %121 = arith.addf %120, %119 : vector<4x32xf32>
    %cst_92 = arith.constant 1.000000e+00 : f32
    %122 = vector.broadcast %cst_92 : f32 to vector<4x32xf32>
    %123 = arith.divf %122, %121 : vector<4x32xf32>
    %c0_93 = arith.constant 0 : index
    %c0_94 = arith.constant 0 : index
    %124 = vector.load %arg5[%c0_93, %c0_94] : memref<48x64xf32, #tpu.memory_space<vmem>>, vector<48x64xf32>
    tpu.vector_store %arg5[%c0_93, %c0_94], %0 {strides = array<i32>} : memref<48x64xf32, #tpu.memory_space<vmem>>, vector<48x64xf32>,
    %c8_95 = arith.constant 8 : index
    %c0_96 = arith.constant 0 : index
    %125 = vector.load %arg5[%c8_95, %c0_96] : memref<48x64xf32, #tpu.memory_space<vmem>>, vector<4x32xf32>
    tpu.vector_store %arg5[%c8_95, %c0_96], %123 {strides = array<i32>} : memref<48x64xf32, #tpu.memory_space<vmem>>, vector<4x32xf32>,
    %c7_97 = arith.constant 7 : index
    %c0_98 = arith.constant 0 : index
    %126 = vector.load %arg5[%c7_97, %c0_98] : memref<48x64xf32, #tpu.memory_space<vmem>>, vector<4x32xf32>
    %c176 = arith.constant 176 : index
    %c0_99 = arith.constant 0 : index
    %127 = vector.load %arg3[%c176, %c0_99] : memref<256x128xf32, #tpu.memory_space<vmem>>, vector<4x32xf32>
    %128 = arith.mulf %126, %127 : vector<4x32xf32>
    %c9_100 = arith.constant 9 : index
    %c0_101 = arith.constant 0 : index
    %129 = vector.load %arg5[%c9_100, %c0_101] : memref<48x64xf32, #tpu.memory_space<vmem>>, vector<4x32xf32>
    %c184 = arith.constant 184 : index
    %c0_102 = arith.constant 0 : index
    %130 = vector.load %arg3[%c184, %c0_102] : memref<256x128xf32, #tpu.memory_space<vmem>>, vector<4x32xf32>
    %131 = arith.mulf %129, %130 : vector<4x32xf32>
    %132 = tpu.concatenate %123, %128, %131 in 1 : vector<4x32xf32>, vector<4x32xf32>, vector<4x32xf32> -> vector<4x96xf32>
    %133 = arith.truncf %132 : vector<4x96xf32> to vector<4x96xbf16>
    %c592 = arith.constant 592 : index
    %c0_103 = arith.constant 0 : index
    %134 = vector.load %arg2[%c592, %c0_103] : memref<992x128xbf16, #tpu.memory_space<vmem>>, vector<96x16xbf16>
    %cst_104 = arith.constant dense<0.000000e+00> : vector<4x16xf32>
    %135 = tpu.matmul %133, %134, %cst_104 {dimension_numbers = #tpu.dot_dimension_numbers<[1], [0], [0], [1], [0, 0, 1, 1], [], []>} : vector<4x96xbf16>, vector<96x16xbf16>, vector<4x16xf32> -> vector<4x16xf32>
    %c168 = arith.constant 168 : index
    %c0_105 = arith.constant 0 : index
    %136 = vector.load %arg3[%c168, %c0_105] : memref<256x128xf32, #tpu.memory_space<vmem>>, vector<1x16xf32>
    %137 = vector.broadcast %136 : vector<1x16xf32> to vector<4x16xf32>
    %138 = arith.addf %135, %137 : vector<4x16xf32>
    %cst_106 = arith.constant 0.000000e+00 : f32
    %139 = vector.broadcast %cst_106 : f32 to vector<4x16xf32>
    %140 = arith.maximumf %138, %139 : vector<4x16xf32>
    %c688 = arith.constant 688 : index
    %c0_107 = arith.constant 0 : index
    %141 = vector.load %arg2[%c688, %c0_107] : memref<992x128xbf16, #tpu.memory_space<vmem>>, vector<8x4xbf16>
    %142 = arith.truncf %140 : vector<4x16xf32> to vector<4x16xbf16>
    %cst_108 = arith.constant dense<0.000000e+00> : vector<8x16xf32>
    %143 = tpu.matmul %141, %142, %cst_108 {dimension_numbers = #tpu.dot_dimension_numbers<[1], [0], [0], [1], [0, 0, 1, 1], [], []>} : vector<8x4xbf16>, vector<4x16xbf16>, vector<8x16xf32> -> vector<8x16xf32>
    %144 = arith.truncf %143 : vector<8x16xf32> to vector<8x16xbf16>
    %c704 = arith.constant 704 : index
    %c0_109 = arith.constant 0 : index
    %145 = vector.load %arg2[%c704, %c0_109] : memref<992x128xbf16, #tpu.memory_space<vmem>>, vector<16x32xbf16>
    %cst_110 = arith.constant dense<0.000000e+00> : vector<8x32xf32>
    %146 = tpu.matmul %144, %145, %cst_110 {dimension_numbers = #tpu.dot_dimension_numbers<[1], [0], [0], [1], [0, 0, 1, 1], [], []>} : vector<8x16xbf16>, vector<16x32xbf16>, vector<8x32xf32> -> vector<8x32xf32>
    %c0_111 = arith.constant 0 : index
    %c0_112 = arith.constant 0 : index
    %147 = vector.load %arg5[%c0_111, %c0_112] : memref<48x64xf32, #tpu.memory_space<vmem>>, vector<48x64xf32>
    tpu.vector_store %arg5[%c0_111, %c0_112], %0 {strides = array<i32>} : memref<48x64xf32, #tpu.memory_space<vmem>>, vector<48x64xf32>,
    %c8_113 = arith.constant 8 : index
    %c0_114 = arith.constant 0 : index
    %148 = vector.load %arg5[%c8_113, %c0_114] : memref<48x64xf32, #tpu.memory_space<vmem>>, vector<8x32xf32>
    tpu.vector_store %arg5[%c8_113, %c0_114], %146 {strides = array<i32>} : memref<48x64xf32, #tpu.memory_space<vmem>>, vector<8x32xf32>,
    %c7_115 = arith.constant 7 : index
    %c0_116 = arith.constant 0 : index
    %149 = vector.load %arg5[%c7_115, %c0_116] : memref<48x64xf32, #tpu.memory_space<vmem>>, vector<8x32xf32>
    %c200 = arith.constant 200 : index
    %c0_117 = arith.constant 0 : index
    %150 = vector.load %arg3[%c200, %c0_117] : memref<256x128xf32, #tpu.memory_space<vmem>>, vector<8x32xf32>
    %151 = arith.mulf %149, %150 : vector<8x32xf32>
    %c9_118 = arith.constant 9 : index
    %c0_119 = arith.constant 0 : index
    %152 = vector.load %arg5[%c9_118, %c0_119] : memref<48x64xf32, #tpu.memory_space<vmem>>, vector<8x32xf32>
    %c208 = arith.constant 208 : index
    %c0_120 = arith.constant 0 : index
    %153 = vector.load %arg3[%c208, %c0_120] : memref<256x128xf32, #tpu.memory_space<vmem>>, vector<8x32xf32>
    %154 = arith.mulf %152, %153 : vector<8x32xf32>
    %155 = tpu.concatenate %146, %151, %154 in 1 : vector<8x32xf32>, vector<8x32xf32>, vector<8x32xf32> -> vector<8x96xf32>
    %156 = arith.truncf %155 : vector<8x96xf32> to vector<8x96xbf16>
    %c720 = arith.constant 720 : index
    %c0_121 = arith.constant 0 : index
    %157 = vector.load %arg2[%c720, %c0_121] : memref<992x128xbf16, #tpu.memory_space<vmem>>, vector<96x16xbf16>
    %cst_122 = arith.constant dense<0.000000e+00> : vector<8x16xf32>
    %158 = tpu.matmul %156, %157, %cst_122 {dimension_numbers = #tpu.dot_dimension_numbers<[1], [0], [0], [1], [0, 0, 1, 1], [], []>} : vector<8x96xbf16>, vector<96x16xbf16>, vector<8x16xf32> -> vector<8x16xf32>
    %c192 = arith.constant 192 : index
    %c0_123 = arith.constant 0 : index
    %159 = vector.load %arg3[%c192, %c0_123] : memref<256x128xf32, #tpu.memory_space<vmem>>, vector<1x16xf32>
    %160 = vector.broadcast %159 : vector<1x16xf32> to vector<8x16xf32>
    %161 = arith.addf %158, %160 : vector<8x16xf32>
    %cst_124 = arith.constant 0.000000e+00 : f32
    %162 = vector.broadcast %cst_124 : f32 to vector<8x16xf32>
    %163 = arith.maximumf %161, %162 : vector<8x16xf32>
    %c816 = arith.constant 816 : index
    %c0_125 = arith.constant 0 : index
    %164 = vector.load %arg2[%c816, %c0_125] : memref<992x128xbf16, #tpu.memory_space<vmem>>, vector<16x8xbf16>
    %165 = arith.truncf %163 : vector<8x16xf32> to vector<8x16xbf16>
    %cst_126 = arith.constant dense<0.000000e+00> : vector<16x16xf32>
    %166 = tpu.matmul %164, %165, %cst_126 {dimension_numbers = #tpu.dot_dimension_numbers<[1], [0], [0], [1], [0, 0, 1, 1], [], []>} : vector<16x8xbf16>, vector<8x16xbf16>, vector<16x16xf32> -> vector<16x16xf32>
    %167 = arith.truncf %166 : vector<16x16xf32> to vector<16x16xbf16>
    %c832 = arith.constant 832 : index
    %c0_127 = arith.constant 0 : index
    %168 = vector.load %arg2[%c832, %c0_127] : memref<992x128xbf16, #tpu.memory_space<vmem>>, vector<16x32xbf16>
    %cst_128 = arith.constant dense<0.000000e+00> : vector<16x32xf32>
    %169 = tpu.matmul %167, %168, %cst_128 {dimension_numbers = #tpu.dot_dimension_numbers<[1], [0], [0], [1], [0, 0, 1, 1], [], []>} : vector<16x16xbf16>, vector<16x32xbf16>, vector<16x32xf32> -> vector<16x32xf32>
    %c0_129 = arith.constant 0 : index
    %c0_130 = arith.constant 0 : index
    %170 = vector.load %arg5[%c0_129, %c0_130] : memref<48x64xf32, #tpu.memory_space<vmem>>, vector<48x64xf32>
    tpu.vector_store %arg5[%c0_129, %c0_130], %0 {strides = array<i32>} : memref<48x64xf32, #tpu.memory_space<vmem>>, vector<48x64xf32>,
    %c8_131 = arith.constant 8 : index
    %c0_132 = arith.constant 0 : index
    %171 = vector.load %arg5[%c8_131, %c0_132] : memref<48x64xf32, #tpu.memory_space<vmem>>, vector<16x32xf32>
    tpu.vector_store %arg5[%c8_131, %c0_132], %169 {strides = array<i32>} : memref<48x64xf32, #tpu.memory_space<vmem>>, vector<16x32xf32>,
    %c7_133 = arith.constant 7 : index
    %c0_134 = arith.constant 0 : index
    %172 = vector.load %arg5[%c7_133, %c0_134] : memref<48x64xf32, #tpu.memory_space<vmem>>, vector<16x32xf32>
    %c224_135 = arith.constant 224 : index
    %c0_136 = arith.constant 0 : index
    %173 = vector.load %arg3[%c224_135, %c0_136] : memref<256x128xf32, #tpu.memory_space<vmem>>, vector<16x32xf32>
    %174 = arith.mulf %172, %173 : vector<16x32xf32>
    %c9_137 = arith.constant 9 : index
    %c0_138 = arith.constant 0 : index
    %175 = vector.load %arg5[%c9_137, %c0_138] : memref<48x64xf32, #tpu.memory_space<vmem>>, vector<16x32xf32>
    %c240_139 = arith.constant 240 : index
    %c0_140 = arith.constant 0 : index
    %176 = vector.load %arg3[%c240_139, %c0_140] : memref<256x128xf32, #tpu.memory_space<vmem>>, vector<16x32xf32>
    %177 = arith.mulf %175, %176 : vector<16x32xf32>
    %178 = tpu.concatenate %169, %174, %177 in 1 : vector<16x32xf32>, vector<16x32xf32>, vector<16x32xf32> -> vector<16x96xf32>
    %179 = arith.truncf %178 : vector<16x96xf32> to vector<16x96xbf16>
    %c848 = arith.constant 848 : index
    %c0_141 = arith.constant 0 : index
    %180 = vector.load %arg2[%c848, %c0_141] : memref<992x128xbf16, #tpu.memory_space<vmem>>, vector<96x8xbf16>
    %cst_142 = arith.constant dense<0.000000e+00> : vector<16x8xf32>
    %181 = tpu.matmul %179, %180, %cst_142 {dimension_numbers = #tpu.dot_dimension_numbers<[1], [0], [0], [1], [0, 0, 1, 1], [], []>} : vector<16x96xbf16>, vector<96x8xbf16>, vector<16x8xf32> -> vector<16x8xf32>
    %c216 = arith.constant 216 : index
    %c0_143 = arith.constant 0 : index
    %182 = vector.load %arg3[%c216, %c0_143] : memref<256x128xf32, #tpu.memory_space<vmem>>, vector<1x8xf32>
    %183 = vector.broadcast %182 : vector<1x8xf32> to vector<16x8xf32>
    %184 = arith.addf %181, %183 : vector<16x8xf32>
    %cst_144 = arith.constant 0.000000e+00 : f32
    %185 = vector.broadcast %cst_144 : f32 to vector<16x8xf32>
    %186 = arith.maximumf %184, %185 : vector<16x8xf32>
    %c944 = arith.constant 944 : index
    %c0_145 = arith.constant 0 : index
    %187 = vector.load %arg2[%c944, %c0_145] : memref<992x128xbf16, #tpu.memory_space<vmem>>, vector<32x16xbf16>
    %188 = arith.truncf %186 : vector<16x8xf32> to vector<16x8xbf16>
    %cst_146 = arith.constant dense<0.000000e+00> : vector<32x8xf32>
    %189 = tpu.matmul %187, %188, %cst_146 {dimension_numbers = #tpu.dot_dimension_numbers<[1], [0], [0], [1], [0, 0, 1, 1], [], []>} : vector<32x16xbf16>, vector<16x8xbf16>, vector<32x8xf32> -> vector<32x8xf32>
    %190 = arith.truncf %189 : vector<32x8xf32> to vector<32x8xbf16>
    %c976 = arith.constant 976 : index
    %c0_147 = arith.constant 0 : index
    %191 = vector.load %arg2[%c976, %c0_147] : memref<992x128xbf16, #tpu.memory_space<vmem>>, vector<8x16xbf16>
    %cst_148 = arith.constant dense<0.000000e+00> : vector<32x16xf32>
    %192 = tpu.matmul %190, %191, %cst_148 {dimension_numbers = #tpu.dot_dimension_numbers<[1], [0], [0], [1], [0, 0, 1, 1], [], []>} : vector<32x8xbf16>, vector<8x16xbf16>, vector<32x16xf32> -> vector<32x16xf32>
    %c0_149 = arith.constant 0 : index
    %c0_150 = arith.constant 0 : index
    %193 = vector.load %arg4[%c0_149, %c0_150] : memref<32x16xf32, #tpu.memory_space<vmem>>, vector<32x16xf32>
    tpu.vector_store %arg4[%c0_149, %c0_150], %192 {strides = array<i32>} : memref<32x16xf32, #tpu.memory_space<vmem>>, vector<32x16xf32>,
    return
  }
  func.func @transform_0(%arg0: i32) -> (i32, i32) {
    %c0_i32 = arith.constant 0 : i32
    %c0_i32_0 = arith.constant 0 : i32
    %c0_i32_1 = arith.constant 0 : i32
    return %c0_i32, %c0_i32_0 : i32, i32
  }
  func.func @transform_1(%arg0: i32) -> (i32, i32) {
    %c0_i32 = arith.constant 0 : i32
    %c0_i32_0 = arith.constant 0 : i32
    %c0_i32_1 = arith.constant 0 : i32
    return %c0_i32, %c0_i32_0 : i32, i32
  }
  func.func @transform_2(%arg0: i32) -> (i32, i32) {
    %c0_i32 = arith.constant 0 : i32
    %c0_i32_0 = arith.constant 0 : i32
    %c0_i32_1 = arith.constant 0 : i32
    return %c0_i32, %c0_i32_0 : i32, i32
  }
  func.func @transform_3(%arg0: i32) -> (i32, i32) {
    %c0_i32 = arith.constant 0 : i32
    %c0_i32_0 = arith.constant 0 : i32
    %c0_i32_1 = arith.constant 0 : i32
    return %c0_i32, %c0_i32_0 : i32, i32
  }
}

</mosaic_0001>

<bundles_post_ra>
// kernel: forward.1
= control target key start
LH: loop header
LB: loop body
LE: loop exit
PB: predicated region body
PF: predicated region fallthrough
CT: control target
= control target key end

     0   :  { %8 = vsyncpa [#allocation4], 0  ;;  %s2077_s0 = inlined_call_operand.hbm [shape: f32[32,16], index: 0, kind: input, shape index: {}]   ;;  %s2078_s1 = inlined_call_operand.hbm [shape: bf16[992,128], index: 1, kind: input, shape index: {}]   ;;  %s2079_s2 = inlined_call_operand.hbm [shape: f32[256,128], index: 2, kind: input, shape index: {}]   ;;  %s2080_s3 = inlined_call_operand.hbm [shape: f32[32,16], index: 3, kind: output, shape index: {}]  }
   0x1   :  { %9 = vsyncpa [#allocation7], 0  ;;  %s28_s14 = sshll.u32 %s2078_s1, 4  ;;  %s29_s14 = int_to_ptr.hbm [resolvable:$true] %s28_s14 }
   0x2   :  { %10 = vsyncpa [#allocation5], 0  ;;  %s1794_s15 = smov [#allocation6]   ;;  %s15_s19 = sshll.u32 %s2077_s0, 4  ;;  %s16_s19 = int_to_ptr.hbm [resolvable:$true] %s15_s19 }
   0x3   :  { %s30_s16 = sshll.u32 %s1794_s15, 4  ;;  %s1795_s20 = smov 64   ;;  %s31_s16 = int_to_ptr.vmem [resolvable:$true] %s30_s16 }
   0x4   :  { %s1796_s21 = smov 4   ;;  %s1797_s22 = smov [#allocation3]  }
   0x5   :  { %36 = dma.hbm_to_vmem [thread:$0]  %s29_s14, 7936, %s31_s16, [#allocation7], %s1795_s20, %s1795_s20, %s1796_s21  }
   0x6   :  { %s17_s23 = sshll.u32 %s1797_s22, 4  ;;  %s1798_s24 = smov 128   ;;  %s18_s23 = int_to_ptr.vmem [resolvable:$true] %s17_s23 }
   0x7   :  { %s1799_s1 = smov 8   ;;  %s41_s27 = sshll.u32 %s2079_s2, 4  ;;  %s42_s27 = int_to_ptr.hbm [resolvable:$true] %s41_s27 }
   0x8   :  { %23 = dma.hbm_to_vmem [thread:$0]  %s16_s19, 512, %s18_s23, [#allocation4], %s1798_s24, %s1798_s24, %s1799_s1  }
   0x9   :  { %s1800_s0 = smov [#allocation8]  }
   0xa   :  { %s43_s28 = sshll.u32 %s1800_s0, 4  ;;  %s44_s28 = int_to_ptr.vmem [resolvable:$true] %s43_s28 }
   0xb   :  { %49 = dma.hbm_to_vmem [thread:$0]  %s42_s27, 4096, %s44_s28, [#allocation7], %s1798_s24, %s1798_s24, %s1799_s1  }
   0xc   :  { %1788 = dma.done.wait [#allocation4], 512  }
   0xd   :  { %1789 = vsyncadd [#allocation4], 4294966784 }
   0xe   :  { %1790 = dma.done.wait [#allocation7], 12032  }
   0xf   :  { %1791 = vsyncadd [#allocation7], 4294955264  ;;  %vm67_vm0 = vcmask 523264   ;;  %v1801_v0 = vmov 0.0   ;;  %vm74_vm1 = vcmask 130048   ;;  %v1855_v1 = vld [vmem:[#allocation3] sm:$0xff] }
  0x10   :  { %68 = vst.msk [vmem:[#allocation2] sm:$0xff] %vm67_vm0, %v1801_v0  ;;  %v1857_v2 = vld [vmem:[#allocation3 + $0x8] sm:$0xff]  ;;  %v1861_v3 = vld [vmem:[#allocation3 + $0x10] sm:$0xff]  ;;  %v1865_v4 = vld [vmem:[#allocation3 + $0x18] sm:$0xff]  ;;  %s1802_s2 = smov 16   ;;  %s1803_s29 = smov 32  }
  0x11   :  { %69 = vst.msk [vmem:[#allocation2 + $0x8] sm:$0xff] %vm67_vm0, %v1801_v0  ;;  %v83_v5 = vld [vmem:[#allocation8 + $0x8] sm:$0xff]  ;;  %v84_v6 = vld [vmem:[#allocation8 + $0x10] sm:$0xff]  ;;  %v85_v8 = vld [vmem:[#allocation8 + $0x18] sm:$0xff]  ;;  %vm139_vm2 = vcmask 261120   ;;  %vm172_vm3 = vcmask 392192  }
  0x12   :  { %70 = vst.msk [vmem:[#allocation2 + $0x10] sm:$0xff] %vm67_vm0, %v1801_v0  ;;  %v86_v12 = vld [vmem:[#allocation8 + $0x20] sm:$0xff]  ;;  %v95_v14 = vld [vmem:[#allocation8 + $0x28] sm:$0xff]  ;;  %v96_v17 = vld [vmem:[#allocation8 + $0x30] sm:$0xff]  ;;  %s1804_s30 = smov 96   ;;  %vm397_vm4 = vcmask 785408  }
  0x13   :  { %71 = vst.msk [vmem:[#allocation2 + $0x18] sm:$0xff] %vm67_vm0, %v1801_v0  ;;  %v97_v24 = vld [vmem:[#allocation8 + $0x38] sm:$0xff]  ;;  %v98_v25 = vld [vmem:[#allocation8 + $0x40] sm:$0xff]  ;;  %v1572_v35 = vld [vmem:[#allocation6] sm:$0xff]  ;;  %vm607_vm5 = vcmask 1043456   ;;  %vm603_vm6 = vcmask 64512  }
  0x14   :  { %72 = vst.msk [vmem:[#allocation2 + $0x20] sm:$0xff] %vm67_vm0, %v1801_v0  ;;  %v1574_v33 = vld [vmem:[#allocation6 + $0x10] sm:$0xff]  ;;  %v1573_v34 = vld [vmem:[#allocation6 + $0x8] sm:$0xff]  ;;  %vm684_vm7 = vcmask 257024   ;;  %vm749_vm8 = vcmask 1041408   ;;  %vm745_vm9 = vcmask 31744  }
  0x15   :  { %73 = vst.msk [vmem:[#allocation2 + $0x28] sm:$0xff] %vm67_vm0, %v1801_v0  ;;  %184 = vmatpush.bf16.msra.mxu0 %v1574_v33  ;;  %v1681_v58 = vld [vmem:[#allocation8] ss:$0 sm:$0xff]  ;;  %s1805_s4 = smov [#allocation9]   ;;  %s1306_s8 = sshll.u32 %s2080_s3, 4  ;;  %s1307_s8 = int_to_ptr.hbm [resolvable:$true] %s1306_s8 }
  0x16   :  { %75 = vst.msk [vmem:[#allocation2 + $0x8] sm:$0xff] %vm74_vm1, %v1855_v1  ;;  %v1582_v33 = vld [vmem:[#allocation6 + $0x50] sm:$0xff]  ;;  %s1304_s5 = sshll.u32 %s1805_s4, 4  ;;  %s1305_s5 = int_to_ptr.vmem [resolvable:$true] %s1304_s5 }
  0x17   :  { %76 = vst.msk [vmem:[#allocation2 + $0x10] sm:$0xff] %vm74_vm1, %v1857_v2 }
  0x18   :  { %77 = vst.msk [vmem:[#allocation2 + $0x18] sm:$0xff] %vm74_vm1, %v1861_v3 }
  0x19   :  { %78 = vst.msk [vmem:[#allocation2 + $0x20] sm:$0xff] %vm74_vm1, %v1865_v4  ;;  %185 = vmatpush.bf16.msra.mxu0 %v1573_v34  ;;  %v1581_v34 = vld [vmem:[#allocation6 + $0x48] sm:$0xff] }
  0x1d   :  { %v79_v7 = vld [vmem:[#allocation2 + $0x7] sm:$0xff]  ;;  %186 = vmatpush.bf16.msra.mxu0 %v1572_v35 }
  0x1e   :  { %v80_v9 = vld [vmem:[#allocation2 + $0xf] sm:$0xff]  ;;  %v87_v10 = vmul.f32 %v83_v5, %v79_v7  ;;  %202 = vst.msk [vmem:[#allocation2] sm:$0xff] %vm67_vm0, %v1801_v0 }
  0x1f   :  { %v91_v11 = vld [vmem:[#allocation2 + $0x9] sm:$0xff]  ;;  %v88_v13 = vmul.f32 %v84_v6, %v80_v9  ;;  %v81_v15 = vld [vmem:[#allocation2 + $0x17] sm:$0xff]  ;;  %306 = vst.msk [vmem:[#allocation2] sm:$0xff] %vm67_vm0, %v1801_v0 }
  0x20   :  { %203 = vst.msk [vmem:[#allocation2 + $0x8] sm:$0xff] %vm67_vm0, %v1801_v0  ;;  %v92_v16 = vld [vmem:[#allocation2 + $0x11] sm:$0xff]  ;;  %v82_v18 = vld [vmem:[#allocation2 + $0x1f] sm:$0xff]  ;;  %v89_v19 = vmul.f32 %v85_v8, %v81_v15  ;;  %v99_v26 = vmul.f32 %v95_v14, %v91_v11  ;;  %v1579_v6 = vld [vmem:[#allocation6 + $0x38] sm:$0xff] }
  0x21   :  { %v1641_v20 = vpack.i.bf16 %v88_v13, %v87_v10  ;;  %v90_v21 = vmul.f32 %v86_v12, %v82_v18  ;;  %204 = vst.msk [vmem:[#allocation2 + $0x10] sm:$0xff] %vm67_vm0, %v1801_v0  ;;  %v93_v22 = vld [vmem:[#allocation2 + $0x19] sm:$0xff]  ;;  %v94_v23 = vld [vmem:[#allocation2 + $0x21] sm:$0xff]  ;;  %v100_v27 = vmul.f32 %v96_v17, %v92_v16  ;;  %286 = vmatpush.bf16.msra.mxu2 %v1579_v6 }
  0x22   :  { %205 = vst.msk [vmem:[#allocation2 + $0x18] sm:$0xff] %vm67_vm0, %v1801_v0  ;;  %v101_v29 = vmul.f32 %v97_v24, %v93_v22  ;;  %v102_v30 = vmul.f32 %v98_v25, %v94_v23  ;;  %v1576_v22 = vld [vmem:[#allocation6 + $0x20] sm:$0xff] }
  0x23   :  { %1642 = vrot.lane.b32.xlu0 %v1641_v20, %s1802_s2  ;;  %v1651_v28 = vpack.i.bf16 %v90_v21, %v89_v19  ;;  %206 = vst.msk [vmem:[#allocation2 + $0x20] sm:$0xff] %vm67_vm0, %v1801_v0  ;;  %v1646_v31 = vpack.i.bf16 %v100_v27, %v99_v26  ;;  %v1575_v19 = vld [vmem:[#allocation6 + $0x18] sm:$0xff]  ;;  %v1578_v20 = vld [vmem:[#allocation6 + $0x30] sm:$0xff]  ;;  %v1577_v21 = vld [vmem:[#allocation6 + $0x28] sm:$0xff] }
  0x24   :  { %207 = vst.msk [vmem:[#allocation2 + $0x28] sm:$0xff] %vm67_vm0, %v1801_v0  ;;  %v1656_v32 = vpack.i.bf16 %v102_v30, %v101_v29  ;;  %v1584_v29 = vld [vmem:[#allocation6 + $0x60] sm:$0xff]  ;;  %v1583_v30 = vld [vmem:[#allocation6 + $0x58] sm:$0xff] }
  0x25   :  { %1652 = vrot.lane.b32.xlu1 %v1651_v28, %s1802_s2  ;;  %287 = vmatpush.bf16.msra.mxu2 %v1578_v20  ;;  %v1585_v28 = vld [vmem:[#allocation6 + $0x68] sm:$0xff] }
  0x26   :  { %403 = vmatpush.bf16.msra.mxu3 %v1585_v28 }
  0x29   :  { %288 = vmatpush.bf16.msra.mxu2 %v1577_v21 }
  0x2a   :  { %404 = vmatpush.bf16.msra.mxu3 %v1584_v29  ;;  %v512_v29 = vld [vmem:[#allocation8 + $0x80] sm:$0xff] }
  0x2b   :  { %1647 = vrot.lane.b32.xlu0 %v1646_v31, %s1803_s29 }
  0x2d   :  { %1657 = vrot.lane.b32.xlu1 %v1656_v32, %s1803_s29  ;;  %289 = vmatpush.bf16.msra.mxu2 %v1576_v22  ;;  %v1595_v22 = vld [vmem:[#allocation6 + $0xc0] sm:$0xff] }
  0x2e   :  { %405 = vmatpush.bf16.msra.mxu3 %v1583_v30  ;;  %580 = vmatpush.bf16.msrb.mxu0 %v1595_v22  ;;  %v509_v30 = vld [vmem:[#allocation8 + $0x78] sm:$0xff] }
  0x32   :  { %406 = vmatpush.bf16.msra.mxu3 %v1582_v33 }
  0x36   :  { %407 = vmatpush.bf16.msra.mxu3 %v1581_v34 }
  0x95   :  { %v1643_v36 = vpop.permute.xlu0 %1642 }
  0x96   :  { %v1645_v37 = vunpack.i.h.bf16 %v1643_v36  ;;  %v1644_v38 = vunpack.i.l.bf16 %v1643_v36 }
  0x97   :  { %v1653_v40 = vpop.permute.xlu1 %1652 }
  0x98   :  { %v136_v43 = vsel %vm74_vm1, %v1857_v2, %v1645_v37  ;;  %v135_v44 = vsel %vm74_vm1, %v1855_v1, %v1644_v38  ;;  %v1655_v48 = vunpack.i.h.bf16 %v1653_v40  ;;  %v1654_v49 = vunpack.i.l.bf16 %v1653_v40  ;;  %v316_v38 = vld [vmem:[#allocation8 + $0x50] sm:$0xff]  ;;  %v323_v40 = vld [vmem:[#allocation8 + $0x68] sm:$0xff] }
  0x9a   :  { %v138_v53 = vsel %vm74_vm1, %v1865_v4, %v1655_v48  ;;  %v137_v54 = vsel %vm74_vm1, %v1861_v3, %v1654_v49 }
  0x9d   :  { %v1648_v39 = vpop.permute.xlu0 %1647 }
  0x9e   :  { %v1650_v41 = vunpack.i.h.bf16 %v1648_v39  ;;  %v1649_v42 = vunpack.i.l.bf16 %v1648_v39  ;;  %v322_v39 = vld [vmem:[#allocation8 + $0x60] sm:$0xff] }
  0x9f   :  { %v1658_v50 = vpop.permute.xlu1 %1657 }
  0xa0   :  { %v140_v45 = vsel %vm139_vm2, %v135_v44, %v1649_v42  ;;  %v141_v46 = vsel %vm139_vm2, %v136_v43, %v1650_v41  ;;  %v1660_v51 = vunpack.i.h.bf16 %v1658_v50  ;;  %v1659_v52 = vunpack.i.l.bf16 %v1658_v50  ;;  %v317_v41 = vld [vmem:[#allocation8 + $0x58] sm:$0xff] }
  0xa1   :  { %v144_v47 = vpack.c.bf16 %v141_v46, %v140_v45 }
  0xa2   :  { %v142_v55 = vsel %vm139_vm2, %v137_v54, %v1659_v52  ;;  %v143_v56 = vsel %vm139_vm2, %v138_v53, %v1660_v51  ;;  %v1580_v51 = vld [vmem:[#allocation6 + $0x40] sm:$0xff] }
  0xa3   :  { %1332 = vmatmul.msk.bf16.vlgmr.msra.gmra.mxu0 %vm172_vm3, %v144_v47  ;;  %v145_v57 = vpack.c.bf16 %v143_v56, %v142_v55  ;;  %408 = vmatpush.bf16.msra.mxu3 %v1580_v51 }
  0xb3   :  { %1333 = vmatmul.msk.bf16.gmra.mxu0 %vm172_vm3, %v145_v57 }
 0x120   :  { %v188_v59 = vpop.f32.mrf.mxu0 }
 0x121   :  { %v189_v60 = vadd.f32 %v1681_v58, %v188_v59 }
 0x123   :  { %v198_v61 = vmax.f32 %v189_v60, 0.0 }
 0x125   :  { %208 = vst.msk [vmem:[#allocation2 + $0x8] sm:$0xff] %vm67_vm0, %v198_v61 }
 0x128   :  { %v190_v62 = vpop.f32.mrf.mxu0 }
 0x129   :  { %v191_v63 = vadd.f32 %v1681_v58, %v190_v62 }
 0x12b   :  { %v199_v1 = vmax.f32 %v191_v63, 0.0  ;;  %v1589_v63 = vld [vmem:[#allocation6 + $0x90] sm:$0xff] }
 0x12c   :  { %487 = vmatpush.bf16.msrb.mxu2 %v1589_v63 }
 0x12d   :  { %209 = vst.msk [vmem:[#allocation2 + $0x10] sm:$0xff] %vm67_vm0, %v199_v1 }
 0x130   :  { %v193_v2 = vpop.f32.mrf.mxu0 }
 0x131   :  { %v194_v4 = vadd.f32 %v1681_v58, %v193_v2  ;;  %v1588_v2 = vld [vmem:[#allocation6 + $0x88] sm:$0xff] }
 0x132   :  { %488 = vmatpush.bf16.msrb.mxu2 %v1588_v2 }
 0x133   :  { %v200_v3 = vmax.f32 %v194_v4, 0.0 }
 0x134   :  { %v212_v5 = vld [vmem:[#allocation2 + $0x9] sm:$0xff] }
 0x135   :  { %307 = vst.msk [vmem:[#allocation2 + $0x8] sm:$0xff] %vm67_vm0, %v1801_v0  ;;  %v216_v17 = vmax.f32 %v198_v61, %v212_v5  ;;  %v1587_v5 = vld [vmem:[#allocation6 + $0x80] sm:$0xff] }
 0x136   :  { %210 = vst.msk [vmem:[#allocation2 + $0x18] sm:$0xff] %vm67_vm0, %v200_v3  ;;  %489 = vmatpush.bf16.msrb.mxu2 %v1587_v5 }
 0x138   :  { %v195_v7 = vpop.f32.mrf.mxu0 }
 0x139   :  { %v196_v8 = vadd.f32 %v1681_v58, %v195_v7 }
 0x13b   :  { %v201_v9 = vmax.f32 %v196_v8, 0.0 }
 0x13d   :  { %v213_v10 = vld [vmem:[#allocation2 + $0x11] sm:$0xff]  ;;  %211 = vst.msk [vmem:[#allocation2 + $0x20] sm:$0xff] %vm67_vm0, %v201_v9 }
 0x13e   :  { %308 = vst.msk [vmem:[#allocation2 + $0x10] sm:$0xff] %vm67_vm0, %v1801_v0  ;;  %v217_v16 = vmax.f32 %v199_v1, %v213_v10  ;;  %v1682_v1 = vld [vmem:[#allocation8 + $0x48] ss:$0 sm:$0xff] }
 0x140   :  { %v220_v18 = vpack.c.bf16 %v217_v16, %v216_v17  ;;  %v1586_v16 = vld [vmem:[#allocation6 + $0x78] sm:$0xff] }
 0x141   :  { %490 = vmatpush.bf16.msrb.mxu2 %v1586_v16 }
 0x144   :  { %v214_v11 = vld [vmem:[#allocation2 + $0x19] sm:$0xff]  ;;  %v215_v12 = vld [vmem:[#allocation2 + $0x21] sm:$0xff] }
 0x145   :  { %310 = vst.msk [vmem:[#allocation2 + $0x20] sm:$0xff] %vm67_vm0, %v1801_v0  ;;  %v218_v13 = vmax.f32 %v200_v3, %v214_v11  ;;  %v219_v14 = vmax.f32 %v201_v9, %v215_v12 }
 0x146   :  { %311 = vst.msk [vmem:[#allocation2 + $0x28] sm:$0xff] %vm67_vm0, %v1801_v0 }
 0x147   :  { %421 = vst.msk [vmem:[#allocation2 + $0x20] sm:$0xff] %vm67_vm0, %v1801_v0  ;;  %v221_v15 = vpack.c.bf16 %v219_v14, %v218_v13 }
 0x148   :  { %422 = vst.msk [vmem:[#allocation2 + $0x28] sm:$0xff] %vm67_vm0, %v1801_v0 }
 0x149   :  { %505 = vst.msk [vmem:[#allocation2 + $0x20] sm:$0xff] %vm67_vm0, %v1801_v0  ;;  %238 = vmatpush.bf16.msra.mxu1 %v221_v15  ;;  %v430_v15 = vld [vmem:[#allocation6 + $0x70] sm:$0xf] }
 0x14a   :  { %506 = vst.msk [vmem:[#allocation2 + $0x28] sm:$0xff] %vm67_vm0, %v1801_v0 }
 0x14b   :  { %596 = vst.msk [vmem:[#allocation2 + $0x20] sm:$0xff] %vm67_vm0, %v1801_v0 }
 0x14c   :  { %597 = vst.msk [vmem:[#allocation2 + $0x28] sm:$0xff] %vm67_vm0, %v1801_v0 }
 0x14d   :  { %682 = vst.msk [vmem:[#allocation2 + $0x20] sm:$0xff] %vm67_vm0, %v1801_v0  ;;  %239 = vmatpush.bf16.msra.mxu1 %v220_v18 }
 0x14e   :  { %683 = vst.msk [vmem:[#allocation2 + $0x28] sm:$0xff] %vm67_vm0, %v1801_v0 }
 0x14f   :  { %837 = vst.msk [vmem:[#allocation2 + $0x20] sm:$0xff] %vm67_vm0, %v1801_v0 }
 0x150   :  { %838 = vst.msk [vmem:[#allocation2 + $0x28] sm:$0xff] %vm67_vm0, %v1801_v0  ;;  %1338 = vmatmul.msk.bf16.vlgmr.msra.gmra.mxu1 %vm139_vm2, %v1575_v19 }
 0x151   :  { %974 = vst.msk [vmem:[#allocation2 + $0x20] sm:$0xff] %vm67_vm0, %v1801_v0 }
 0x152   :  { %975 = vst.msk [vmem:[#allocation2 + $0x28] sm:$0xff] %vm67_vm0, %v1801_v0 }
 0x153   :  { %1119 = vst.msk [vmem:[#allocation2 + $0x20] sm:$0xff] %vm67_vm0, %v1801_v0 }
 0x154   :  { %1120 = vst.msk [vmem:[#allocation2 + $0x28] sm:$0xff] %vm67_vm0, %v1801_v0 }
 0x155   :  { %309 = vst.msk [vmem:[#allocation2 + $0x18] sm:$0xff] %vm67_vm0, %v1801_v0 }
 0x1cd   :  { %v241_v23 = vpop.f32.mrf.mxu1 }
 0x1d5   :  { %v243_v24 = vpop.f32.mrf.mxu1 }
 0x1d6   :  { %v246_v25 = vpack.c.bf16 %v243_v24, %v241_v23  ;;  %v1594_v23 = vld [vmem:[#allocation6 + $0xb8] sm:$0xff]  ;;  %v1593_v24 = vld [vmem:[#allocation6 + $0xb0] sm:$0xff] }
 0x1d7   :  { %581 = vmatpush.bf16.msrb.mxu0 %v1594_v23 }
 0x1d8   :  { %1355 = vmatmul.msk.bf16.vlgmr.msra.gmra.mxu2 %vm67_vm0, %v246_v25  ;;  %v1592_v25 = vld [vmem:[#allocation6 + $0xa8] sm:$0xff] }
 0x1db   :  { %582 = vmatpush.bf16.msrb.mxu0 %v1593_v24  ;;  %v799_v24 = vld [vmem:[#allocation8 + $0x90] sm:$0xf] }
 0x1df   :  { %583 = vmatpush.bf16.msrb.mxu0 %v1592_v25 }
 0x25b   :  { %v291_v26 = vpop.f32.mrf.mxu2 }
 0x25c   :  { %298 = vrot.lane.b32.xlu2 %v291_v26, %s1804_s30 }
 0x263   :  { %v293_v27 = vpop.f32.mrf.mxu2 }
 0x264   :  { %300 = vrot.lane.b32.xlu2 %v293_v27, %s1804_s30 }
 0x2b6   :  { %v299_v31 = vpop.permute.xlu2 %298 }
 0x2b7   :  { %v304_v32 = vmax.f32 %v291_v26, %v299_v31  ;;  %v1591_v26 = vld [vmem:[#allocation6 + $0xa0] sm:$0xff] }
 0x2b8   :  { %584 = vmatpush.bf16.msrb.mxu0 %v1591_v26  ;;  %v812_v26 = vld [vmem:[#allocation8 + $0xa0] sm:$0xf] }
 0x2b9   :  { %312 = vst.msk [vmem:[#allocation2 + $0x8] sm:$0xff] %vm139_vm2, %v304_v32 }
 0x2be   :  { %v301_v35 = vpop.permute.xlu2 %300 }
 0x2bf   :  { %v305_v36 = vmax.f32 %v293_v27, %v301_v35  ;;  %v1590_v35 = vld [vmem:[#allocation6 + $0x98] sm:$0xff] }
 0x2c0   :  { %v314_v37 = vld [vmem:[#allocation2 + $0x7] sm:$0xff]  ;;  %585 = vmatpush.bf16.msrb.mxu0 %v1590_v35 }
 0x2c1   :  { %417 = vst.msk [vmem:[#allocation2] sm:$0xff] %vm67_vm0, %v1801_v0  ;;  %v318_v47 = vmul.f32 %v316_v38, %v314_v37 }
 0x2c2   :  { %501 = vst.msk [vmem:[#allocation2] sm:$0xff] %vm67_vm0, %v1801_v0 }
 0x2c3   :  { %313 = vst.msk [vmem:[#allocation2 + $0x10] sm:$0xff] %vm139_vm2, %v305_v36 }
 0x2ca   :  { %v315_v42 = vld [vmem:[#allocation2 + $0xf] sm:$0xff] }
 0x2cb   :  { %v320_v43 = vld [vmem:[#allocation2 + $0x9] sm:$0xff]  ;;  %v321_v44 = vld [vmem:[#allocation2 + $0x11] sm:$0xff]  ;;  %v319_v48 = vmul.f32 %v317_v41, %v315_v42 }
 0x2cc   :  { %418 = vst.msk [vmem:[#allocation2 + $0x8] sm:$0xff] %vm67_vm0, %v1801_v0  ;;  %v324_v45 = vmul.f32 %v322_v39, %v320_v43  ;;  %v325_v46 = vmul.f32 %v323_v40, %v321_v44  ;;  %v1599_v41 = vld [vmem:[#allocation6 + $0xe8] sm:$0xff]  ;;  %v1598_v42 = vld [vmem:[#allocation6 + $0xe0] sm:$0xff]  ;;  %v1597_v43 = vld [vmem:[#allocation6 + $0xd8] sm:$0xff] }
 0x2cd   :  { %419 = vst.msk [vmem:[#allocation2 + $0x10] sm:$0xff] %vm67_vm0, %v1801_v0  ;;  %v1661_v50 = vpack.i.bf16 %v319_v48, %v318_v47  ;;  %664 = vmatpush.bf16.msrb.mxu3 %v1599_v41  ;;  %v1683_v44 = vld [vmem:[#allocation8 + $0x70] ss:$0 sm:$0xff]  ;;  %v1607_v41 = vld [vmem:[#allocation6 + $0x130] sm:$0xff] }
 0x2ce   :  { %v1666_v49 = vpack.i.bf16 %v325_v46, %v324_v45  ;;  %420 = vst.msk [vmem:[#allocation2 + $0x18] sm:$0xff] %vm67_vm0, %v1801_v0 }
 0x2cf   :  { %1662 = vrot.lane.b32.xlu0 %v1661_v50, %s1803_s29 }
 0x2d0   :  { %1667 = vrot.lane.b32.xlu1 %v1666_v49, %s1795_s20 }
 0x2d1   :  { %665 = vmatpush.bf16.msrb.mxu3 %v1598_v42 }
 0x2d5   :  { %666 = vmatpush.bf16.msrb.mxu3 %v1597_v43 }
 0x341   :  { %v1663_v53 = vpop.permute.xlu0 %1662 }
 0x342   :  { %v1668_v52 = vpop.permute.xlu1 %1667  ;;  %v1665_v56 = vunpack.i.h.bf16 %v1663_v53  ;;  %v1664_v57 = vunpack.i.l.bf16 %v1663_v53  ;;  %v602_v53 = vld [vmem:[#allocation6 + $0xc8] sm:$0x3] }
 0x343   :  { %v1670_v54 = vunpack.i.h.bf16 %v1668_v52  ;;  %v1669_v55 = vunpack.i.l.bf16 %v1668_v52 }
 0x344   :  { %v343_v58 = vsel %vm139_vm2, %v305_v36, %v1665_v56  ;;  %v342_v59 = vsel %vm139_vm2, %v304_v32, %v1664_v57 }
 0x345   :  { %v344_v60 = vsel %vm67_vm0, %v342_v59, %v1669_v55  ;;  %v345_v61 = vsel %vm67_vm0, %v343_v58, %v1670_v54  ;;  %v1596_v54 = vld [vmem:[#allocation6 + $0xd0] sm:$0xff] }
 0x346   :  { %v346_v62 = vpack.c.bf16 %v345_v61, %v344_v60  ;;  %667 = vmatpush.bf16.msrb.mxu3 %v1596_v54  ;;  %v1603_v60 = vld [vmem:[#allocation6 + $0x108] sm:$0xff]  ;;  %v1602_v61 = vld [vmem:[#allocation6 + $0x100] sm:$0xff] }
 0x347   :  { %732 = vmatpush.bf16.msra.mxu0 %v1603_v60 }
 0x348   :  { %1380 = vmatmul.msk.bf16.vlgmr.msra.gmra.mxu3 %vm397_vm4, %v346_v62  ;;  %v1601_v62 = vld [vmem:[#allocation6 + $0xf8] sm:$0xff] }
 0x34b   :  { %733 = vmatpush.bf16.msra.mxu0 %v1602_v61  ;;  %v1685_v61 = vld [vmem:[#allocation8 + $0xa8] ss:$0 sm:$0xff] }
 0x34f   :  { %734 = vmatpush.bf16.msra.mxu0 %v1601_v62 }
 0x3cb   :  { %v410_v4 = vpop.f32.mrf.mxu3 }
 0x3cc   :  { %v411_v3 = vadd.f32 %v1682_v1, %v410_v4  ;;  %v1600_v4 = vld [vmem:[#allocation6 + $0xf0] sm:$0xff] }
 0x3cd   :  { %735 = vmatpush.bf16.msra.mxu0 %v1600_v4 }
 0x3ce   :  { %v415_v6 = vmax.f32 %v411_v3, 0.0 }
 0x3d0   :  { %423 = vst.msk [vmem:[#allocation2 + $0x8] sm:$0xff] %vm67_vm0, %v415_v6 }
 0x3d3   :  { %v412_v7 = vpop.f32.mrf.mxu3 }
 0x3d4   :  { %v413_v8 = vadd.f32 %v1682_v1, %v412_v7  ;;  %v1605_v7 = vld [vmem:[#allocation6 + $0x120] sm:$0xff] }
 0x3d5   :  { %792 = vmatpush.bf16.msra.mxu3 %v1605_v7 }
 0x3d6   :  { %v416_v9 = vmax.f32 %v413_v8, 0.0 }
 0x3d8   :  { %424 = vst.msk [vmem:[#allocation2 + $0x10] sm:$0xff] %vm67_vm0, %v416_v9 }
 0x3df   :  { %v426_v10 = vld [vmem:[#allocation2 + $0x11] sm:$0xff]  ;;  %v425_v11 = vld [vmem:[#allocation2 + $0x9] sm:$0xff] }
 0x3e0   :  { %v428_v12 = vmax.f32 %v416_v9, %v426_v10  ;;  %504 = vst.msk [vmem:[#allocation2 + $0x18] sm:$0xff] %vm67_vm0, %v1801_v0  ;;  %v427_v13 = vmax.f32 %v415_v6, %v425_v11  ;;  %v741_v11 = vld [vmem:[#allocation6 + $0x110] sm:$0x3] }
 0x3e1   :  { %595 = vst.msk [vmem:[#allocation2 + $0x18] sm:$0xff] %vm67_vm0, %v1801_v0 }
 0x3e2   :  { %681 = vst.msk [vmem:[#allocation2 + $0x18] sm:$0xff] %vm67_vm0, %v1801_v0  ;;  %v429_v14 = vpack.c.bf16 %v428_v12, %v427_v13  ;;  %v1604_v13 = vld [vmem:[#allocation6 + $0x118] sm:$0xff] }
 0x3e3   :  { %836 = vst.msk [vmem:[#allocation2 + $0x18] sm:$0xff] %vm67_vm0, %v1801_v0  ;;  %793 = vmatpush.bf16.msra.mxu3 %v1604_v13 }
 0x3e4   :  { %973 = vst.msk [vmem:[#allocation2 + $0x18] sm:$0xff] %vm67_vm0, %v1801_v0  ;;  %441 = vmatpush.bf16.msrb.mxu1 %v429_v14  ;;  %v801_v14 = vld [vmem:[#allocation8 + $0x98] sm:$0xf] }
 0x3e5   :  { %502 = vst.msk [vmem:[#allocation2 + $0x8] sm:$0xff] %vm67_vm0, %v1801_v0 }
 0x3e6   :  { %503 = vst.msk [vmem:[#allocation2 + $0x10] sm:$0xff] %vm67_vm0, %v1801_v0 }
 0x3e7   :  { %1118 = vst.msk [vmem:[#allocation2 + $0x18] sm:$0xff] %vm67_vm0, %v1801_v0  ;;  %1381 = vmatmul.msk.bf16.vlgmr.msrb.gmra.mxu1 %vm74_vm1, %v430_v15  ;;  %v1684_v15 = vld [vmem:[#allocation8 + $0x88] ss:$0 sm:$0xff] }
 0x464   :  { %v443_v17 = vpop.f32.mrf.mxu1 }
 0x465   :  { %v447_v18 = vpack.c.bf16 %v443_v17, %v443_v17 }
 0x467   :  { %1398 = vmatmul.msk.bf16.vlgmr.msrb.gmra.mxu2 %vm67_vm0, %v447_v18 }
 0x46c   :  { %v445_v19 = vpop.f32.mrf.mxu1 }
 0x4ea   :  { %v492_v20 = vpop.f32.mrf.mxu2 }
 0x4eb   :  { %497 = vrot.lane.b32.xlu2 %v492_v20, %s1804_s30 }
 0x4f2   :  { %v494_v21 = vpop.f32.mrf.mxu2 }
 0x545   :  { %v498_v27 = vpop.permute.xlu2 %497 }
 0x546   :  { %v500_v28 = vmax.f32 %v492_v20, %v498_v27 }
 0x548   :  { %507 = vst.msk [vmem:[#allocation2 + $0x8] sm:$0xff] %vm139_vm2, %v500_v28 }
 0x54f   :  { %v511_v31 = vld [vmem:[#allocation2 + $0x9] sm:$0xff] }
 0x550   :  { %v508_v32 = vld [vmem:[#allocation2 + $0x7] sm:$0xff]  ;;  %v513_v33 = vmul.f32 %v512_v29, %v511_v31  ;;  %594 = vst.msk [vmem:[#allocation2 + $0x10] sm:$0xff] %vm67_vm0, %v1801_v0 }
 0x551   :  { %v510_v34 = vmul.f32 %v509_v30, %v508_v32  ;;  %593 = vst.msk [vmem:[#allocation2 + $0x8] sm:$0xff] %vm67_vm0, %v1801_v0  ;;  %v1611_v32 = vld [vmem:[#allocation6 + $0x150] sm:$0xff] }
 0x552   :  { %519 = vrot.lane.b32.xlu1 %v513_v33, %s1795_s20  ;;  %592 = vst.msk [vmem:[#allocation2] sm:$0xff] %vm67_vm0, %v1801_v0 }
 0x553   :  { %515 = vrot.lane.b32.xlu0 %v510_v34, %s1803_s29  ;;  %678 = vst.msk [vmem:[#allocation2] sm:$0xff] %vm67_vm0, %v1801_v0  ;;  %v1610_v34 = vld [vmem:[#allocation6 + $0x148] sm:$0xff] }
 0x554   :  { %833 = vst.msk [vmem:[#allocation2] sm:$0xff] %vm67_vm0, %v1801_v0 }
 0x55a   :  { %803 = vrot.lane.b32.xlu1 %v801_v14, %s1803_s29 }
 0x5c4   :  { %v520_v36 = vpop.permute.xlu1 %519 }
 0x5c5   :  { %v516_v37 = vpop.permute.xlu0 %515 }
 0x5c6   :  { %v522_v38 = vsel %vm139_vm2, %v500_v28, %v516_v37  ;;  %v1608_v37 = vld [vmem:[#allocation6 + $0x138] sm:$0xff] }
 0x5c7   :  { %v523_v39 = vsel %vm67_vm0, %v522_v38, %v520_v36  ;;  %v1609_v36 = vld [vmem:[#allocation6 + $0x140] sm:$0xff] }
 0x5c8   :  { %v524_v40 = vpack.c.bf16 %v523_v39, %v523_v39 }
 0x5ca   :  { %1423 = vmatmul.msk.bf16.vlgmr.msrb.gmra.mxu0 %vm397_vm4, %v524_v40 }
 0x5cb   :  { %912 = vmatpush.bf16.msrb.mxu0 %v1611_v32 }
 0x5cc   :  { %v804_v20 = vpop.permute.xlu1 %803 }
 0x5cf   :  { %913 = vmatpush.bf16.msrb.mxu0 %v1610_v34  ;;  %v1619_v34 = vld [vmem:[#allocation6 + $0x198] sm:$0xff] }
 0x5d3   :  { %914 = vmatpush.bf16.msrb.mxu0 %v1609_v36  ;;  %v1620_v36 = vld [vmem:[#allocation6 + $0x1a0] sm:$0xff] }
 0x5d7   :  { %915 = vmatpush.bf16.msrb.mxu0 %v1608_v37 }
 0x5db   :  { %916 = vmatpush.bf16.msrb.mxu0 %v1607_v41 }
 0x647   :  { %v587_v45 = vpop.f32.mrf.mxu0 }
 0x648   :  { %v588_v46 = vadd.f32 %v1683_v44, %v587_v45 }
 0x64a   :  { %v591_v47 = vmax.f32 %v588_v46, 0.0 }
 0x64c   :  { %598 = vst.msk [vmem:[#allocation2 + $0x8] sm:$0xff] %vm67_vm0, %v591_v47 }
 0x64f   :  { %v589_v48 = vpop.f32.mrf.mxu0 }
 0x653   :  { %v599_v49 = vld [vmem:[#allocation2 + $0x9] sm:$0xff] }
 0x654   :  { %v600_v50 = vmax.f32 %v591_v47, %v599_v49  ;;  %680 = vst.msk [vmem:[#allocation2 + $0x10] sm:$0xff] %vm67_vm0, %v1801_v0  ;;  %v844_v49 = vld [vmem:[#allocation8 + $0xb8] sm:$0xf] }
 0x655   :  { %679 = vst.msk [vmem:[#allocation2 + $0x8] sm:$0xff] %vm67_vm0, %v1801_v0 }
 0x656   :  { %v601_v51 = vpack.c.bf16 %v600_v50, %v600_v50  ;;  %835 = vst.msk [vmem:[#allocation2 + $0x10] sm:$0xff] %vm67_vm0, %v1801_v0  ;;  %v841_v50 = vld [vmem:[#allocation8 + $0xb0] sm:$0xf] }
 0x657   :  { %972 = vst.msk [vmem:[#allocation2 + $0x10] sm:$0xff] %vm67_vm0, %v1801_v0 }
 0x658   :  { %v609_v52 = vsel %vm607_vm5, %v601_v51, 0 }
 0x659   :  { %618 = vmatpush.bf16.msra.mxu1 %v609_v52 }
 0x65c   :  { %1424 = vmatmul.msk.bf16.vlgmr.msra.gmra.mxu1 %vm603_vm6, %v602_v53 }
 0x6d9   :  { %v620_v55 = vpop.f32.mrf.mxu1 }
 0x6da   :  { %v624_v56 = vpack.c.bf16 %v620_v55, %v620_v55  ;;  %v1606_v55 = vld [vmem:[#allocation6 + $0x128] sm:$0xff] }
 0x6db   :  { %917 = vmatpush.bf16.msrb.mxu0 %v1606_v55 }
 0x6dc   :  { %1441 = vmatmul.msk.bf16.vlgmr.msrb.gmra.mxu3 %vm67_vm0, %v624_v56 }
 0x6e1   :  { %v622_v57 = vpop.f32.mrf.mxu1 }
 0x75f   :  { %v669_v58 = vpop.f32.mrf.mxu3 }
 0x760   :  { %674 = vrot.lane.b32.xlu2 %v669_v58, %s1804_s30 }
 0x767   :  { %v671_v59 = vpop.f32.mrf.mxu3 }
 0x7ba   :  { %v675_v63 = vpop.permute.xlu2 %674 }
 0x7bb   :  { %v677_v1 = vmax.f32 %v669_v58, %v675_v63 }
 0x7bd   :  { %685 = vst.msk [vmem:[#allocation2 + $0x8] sm:$0xf] %vm684_vm7, %v677_v1 }
 0x7c4   :  { %v686_v2 = vld [vmem:[#allocation2 + $0x9] sm:$0xf] }
 0x7c5   :  { %688 = vrot.lane.b32.xlu0 %v686_v2, %s1803_s29  ;;  %834 = vst.msk [vmem:[#allocation2 + $0x8] sm:$0xff] %vm67_vm0, %v1801_v0 }
 0x837   :  { %v689_v3 = vpop.permute.xlu0 %688 }
 0x838   :  { %v691_v5 = vsel %vm139_vm2, %v677_v1, %v689_v3 }
 0x839   :  { %v692_v6 = vpack.c.bf16 %v691_v5, %v691_v5  ;;  %v924_v5 = vld [vmem:[#allocation6 + $0x158] sm:$0xf] }
 0x83b   :  { %1458 = vmatmul.msk.bf16.vlgmr.msra.gmra.mxu0 %vm67_vm0, %v692_v6  ;;  %v1612_v6 = vld [vmem:[#allocation6 + $0x160] sm:$0xff] }
 0x83c   :  { %1108 = vmatpush.bf16.msra.mxu0 %v1620_v36 }
 0x8b8   :  { %v737_v8 = vpop.f32.mrf.mxu0 }
 0x8b9   :  { %v742_v9 = vpack.c.bf16 %v737_v8, %v737_v8 }
 0x8bb   :  { %v751_v10 = vsel %vm749_vm8, %v742_v9, 0 }
 0x8bc   :  { %760 = vmatpush.bf16.msrb.mxu1 %v751_v10 }
 0x8bf   :  { %1459 = vmatmul.msk.bf16.vlgmr.msrb.gmra.mxu1 %vm745_vm9, %v741_v11  ;;  %v981_v11 = vld [vmem:[#allocation8 + $0xd0] sm:$0xff] }
 0x8c0   :  { %v739_v12 = vpop.f32.mrf.mxu0  ;;  %964 = vmatpush.bf16.msra.mxu1 %v1612_v6 }
 0x8c1   :  { %v978_v12 = vld [vmem:[#allocation8 + $0xc8] sm:$0xff] }
 0x93c   :  { %v762_v16 = vpop.f32.mrf.mxu1 }
 0x93d   :  { %v763_v17 = vadd.f32 %v1684_v15, %v762_v16 }
 0x93f   :  { %v766_v18 = vpack.c.bf16 %v763_v17, %v763_v17 }
 0x941   :  { %1468 = vmatmul.msk.bf16.vlgmr.msra.gmra.mxu3 %vm139_vm2, %v766_v18  ;;  %v1618_v18 = vld [vmem:[#allocation6 + $0x190] sm:$0xff] }
 0x942   :  { %1049 = vmatpush.bf16.msrb.mxu3 %v1618_v18  ;;  %v1627_v18 = vld [vmem:[#allocation6 + $0x1d8] sm:$0xff] }
 0x944   :  { %v764_v19 = vpop.f32.mrf.mxu1 }
 0x945   :  { %v1617_v19 = vld [vmem:[#allocation6 + $0x188] sm:$0xff] }
 0x946   :  { %1050 = vmatpush.bf16.msrb.mxu3 %v1617_v19  ;;  %v1628_v19 = vld [vmem:[#allocation6 + $0x1e0] sm:$0xff] }
 0x9c4   :  { %v795_v21 = vpop.f32.mrf.mxu3 }
 0x9c5   :  { %v806_v22 = vmul.f32 %v804_v20, %v795_v21  ;;  %v800_v25 = vmul.f32 %v799_v24, %v795_v21  ;;  %v1616_v20 = vld [vmem:[#allocation6 + $0x180] sm:$0xff]  ;;  %v1615_v21 = vld [vmem:[#allocation6 + $0x178] sm:$0xff] }
 0x9c6   :  { %1051 = vmatpush.bf16.msrb.mxu3 %v1616_v20  ;;  %v1267_v20 = vld [vmem:[#allocation6 + $0x1e8] sm:$0xf] }
 0x9c7   :  { %808 = vrot.lane.b32.xlu2 %v806_v22, %s1804_s30  ;;  %v1614_v22 = vld [vmem:[#allocation6 + $0x170] sm:$0xff] }
 0x9ca   :  { %1052 = vmatpush.bf16.msrb.mxu3 %v1615_v21  ;;  %v1275_v21 = vsel %vm607_vm5, %v1267_v20, 0 }
 0x9cc   :  { %v797_v23 = vpop.f32.mrf.mxu3 }
 0x9cd   :  { %v1613_v23 = vld [vmem:[#allocation6 + $0x168] sm:$0xff] }
 0x9ce   :  { %1053 = vmatpush.bf16.msrb.mxu3 %v1614_v22 }
 0x9d2   :  { %1054 = vmatpush.bf16.msrb.mxu3 %v1613_v23 }
 0x9d6   :  { %1284 = vmatpush.bf16.msra.mxu3 %v1275_v21 }
 0xa21   :  { %v809_v27 = vpop.permute.xlu2 %808 }
 0xa22   :  { %v811_v28 = vadd.f32 %v809_v27, %v800_v25 }
 0xa24   :  { %v813_v29 = vadd.f32 %v812_v26, %v811_v28  ;;  %v1686_v28 = vld [vmem:[#allocation8 + $0xc0] ss:$0 sm:$0xff] }
 0xa26   :  { %v814_v30 = vsub.f32 0.0, %v813_v29 }
 0xa28   :  { %v815_v31 = vmul.f32 1.442695, %v814_v30 }
 0xa2a   :  { %1688 = vpow2.f32 %v815_v31 }
 0xa30   :  { %v1689_v33 = vpop.eup %1688 }
 0xa31   :  { %v817_v35 = vadd.f32 1.0, %v1689_v33 }
 0xa33   :  { %1690 = vrcp.f32 %v817_v35  ;;  %v829_v42 = vand.u32 2147483648, %v817_v35  ;;  %v827_v44 = vand.u32 2147483647, %v817_v35  ;;  %vm823_vm11 = vweird.f32 %v817_v35 }
 0xa35   :  { %v830_v46 = vor.u32 1.1754944e-38, %v829_v42  ;;  %vm828_vm13 = vcmp.eq.f32.partialorder %v827_v44, 8.507059e+37  ;;  %v1131_v42 = vld [vmem:[#allocation8 + $0xf0] sm:$0xff]  ;;  %v1132_v44 = vld [vmem:[#allocation8 + $0xf8] sm:$0xff] }
 0xa39   :  { %v1691_v38 = vpop.eup %1690 }
 0xa3a   :  { %v819_v39 = vmul.f32 %v1691_v38, %v817_v35  ;;  %vm824_vm10 = vweird.f32 %v1691_v38 }
 0xa3b   :  { %vm825_vm12 = vmor %vm823_vm11, %vm824_vm10 }
 0xa3c   :  { %v820_v40 = vsub.f32 1.0, %v819_v39 }
 0xa3e   :  { %v821_v43 = vmul.f32 %v1691_v38, %v820_v40 }
 0xa40   :  { %v822_v45 = vadd.f32 %v1691_v38, %v821_v43  ;;  %v1125_v43 = vld [vmem:[#allocation8 + $0xe0] sm:$0xff] }
 0xa42   :  { %v826_v47 = vsel %vm825_vm12, %v1691_v38, %v822_v45 }
 0xa43   :  { %v831_v48 = vsel %vm828_vm13, %v830_v46, %v826_v47  ;;  %v1126_v46 = vld [vmem:[#allocation8 + $0xe8] sm:$0xff] }
 0xa44   :  { %839 = vst.msk [vmem:[#allocation2 + $0x8] sm:$0xf] %vm684_vm7, %v831_v48 }
 0xa4b   :  { %v843_v51 = vld [vmem:[#allocation2 + $0x9] sm:$0xf] }
 0xa4c   :  { %v840_v52 = vld [vmem:[#allocation2 + $0x7] sm:$0xf]  ;;  %v845_v53 = vmul.f32 %v844_v49, %v843_v51 }
 0xa4d   :  { %v842_v54 = vmul.f32 %v841_v50, %v840_v52  ;;  %970 = vst.msk [vmem:[#allocation2] sm:$0xff] %vm67_vm0, %v1801_v0 }
 0xa4e   :  { %971 = vst.msk [vmem:[#allocation2 + $0x8] sm:$0xff] %vm67_vm0, %v1801_v0  ;;  %851 = vrot.lane.b32.xlu1 %v845_v53, %s1795_s20 }
 0xa4f   :  { %847 = vrot.lane.b32.xlu0 %v842_v54, %s1803_s29 }
 0xac0   :  { %v852_v56 = vpop.permute.xlu1 %851 }
 0xac1   :  { %v848_v57 = vpop.permute.xlu0 %847 }
 0xac2   :  { %v854_v58 = vsel %vm139_vm2, %v831_v48, %v848_v57  ;;  %v1625_v57 = vld [vmem:[#allocation6 + $0x1c8] sm:$0xff] }
 0xac3   :  { %v855_v59 = vsel %vm67_vm0, %v854_v58, %v852_v56  ;;  %v1626_v56 = vld [vmem:[#allocation6 + $0x1d0] sm:$0xff]  ;;  %v1624_v58 = vld [vmem:[#allocation6 + $0x1c0] sm:$0xff] }
 0xac4   :  { %v856_v60 = vpack.c.bf16 %v855_v59, %v855_v59  ;;  %1211 = vmatpush.bf16.msrb.mxu1 %v1626_v56  ;;  %v1623_v59 = vld [vmem:[#allocation6 + $0x1b8] sm:$0xff] }
 0xac6   :  { %1493 = vmatmul.msk.bf16.vlgmr.msrb.gmra.mxu0 %vm397_vm4, %v856_v60  ;;  %v1622_v60 = vld [vmem:[#allocation6 + $0x1b0] sm:$0xff] }
 0xac8   :  { %1212 = vmatpush.bf16.msrb.mxu1 %v1625_v57 }
 0xacc   :  { %1213 = vmatpush.bf16.msrb.mxu1 %v1624_v58 }
 0xad0   :  { %1214 = vmatpush.bf16.msrb.mxu1 %v1623_v59 }
 0xad4   :  { %1215 = vmatpush.bf16.msrb.mxu1 %v1622_v60 }
 0xb43   :  { %v919_v62 = vpop.f32.mrf.mxu0 }
 0xb44   :  { %v920_v63 = vadd.f32 %v1685_v61, %v919_v62  ;;  %v1621_v61 = vld [vmem:[#allocation6 + $0x1a8] sm:$0xff] }
 0xb45   :  { %1216 = vmatpush.bf16.msrb.mxu1 %v1621_v61 }
 0xb46   :  { %v923_v1 = vmax.f32 %v920_v63, 0.0 }
 0xb48   :  { %v925_v2 = vpack.c.bf16 %v923_v1, %v923_v1 }
 0xb4a   :  { %v930_v4 = vsel %vm749_vm8, %v925_v2, 0 }
 0xb4b   :  { %v921_v3 = vpop.f32.mrf.mxu0  ;;  %939 = vmatpush.bf16.msra.mxu2 %v930_v4 }
 0xb4e   :  { %1494 = vmatmul.msk.bf16.vlgmr.msra.gmra.mxu2 %vm745_vm9, %v924_v5 }
 0xbd1   :  { %v941_v7 = vpop.f32.mrf.mxu2 }
 0xbd2   :  { %v945_v8 = vpack.c.bf16 %v941_v7, %v941_v7 }
 0xbd4   :  { %1499 = vmatmul.msk.bf16.vlgmr.msra.gmra.mxu1 %vm74_vm1, %v945_v8 }
 0xbd9   :  { %v943_v9 = vpop.f32.mrf.mxu2 }
 0xc51   :  { %v966_v10 = vpop.f32.mrf.mxu1 }
 0xc52   :  { %976 = vst.msk [vmem:[#allocation2 + $0x8] sm:$0xff] %vm139_vm2, %v966_v10 }
 0xc59   :  { %v968_v13 = vpop.f32.mrf.mxu1  ;;  %v980_v14 = vld [vmem:[#allocation2 + $0x9] sm:$0xff] }
 0xc5a   :  { %v977_v15 = vld [vmem:[#allocation2 + $0x7] sm:$0xff]  ;;  %v982_v16 = vmul.f32 %v981_v11, %v980_v14  ;;  %1117 = vst.msk [vmem:[#allocation2 + $0x10] sm:$0xff] %vm67_vm0, %v1801_v0  ;;  %v1687_v11 = vld [vmem:[#allocation8 + $0xd8] ss:$0 sm:$0xff] }
 0xc5b   :  { %v979_v17 = vmul.f32 %v978_v12, %v977_v15  ;;  %1115 = vst.msk [vmem:[#allocation2] sm:$0xff] %vm67_vm0, %v1801_v0 }
 0xc5c   :  { %988 = vrot.lane.b32.xlu0 %v982_v16, %s1795_s20  ;;  %1116 = vst.msk [vmem:[#allocation2 + $0x8] sm:$0xff] %vm67_vm0, %v1801_v0 }
 0xc5d   :  { %984 = vrot.lane.b32.xlu2 %v979_v17, %s1803_s29 }
 0xcb7   :  { %v985_v24 = vpop.permute.xlu2 %984 }
 0xcb8   :  { %v991_v25 = vsel %vm139_vm2, %v966_v10, %v985_v24 }
 0xcce   :  { %v989_v26 = vpop.permute.xlu0 %988 }
 0xccf   :  { %v992_v0 = vsel %vm67_vm0, %v991_v25, %v989_v26 }
 0xcd0   :  { %v993_v27 = vpack.c.bf16 %v992_v0, %v992_v0 }
 0xcd2   :  { %1524 = vmatmul.msk.bf16.vlgmr.msrb.gmra.mxu3 %vm397_vm4, %v993_v27 }
 0xd55   :  { %v1056_v29 = vpop.f32.mrf.mxu3 }
 0xd56   :  { %v1057_v30 = vadd.f32 %v1686_v28, %v1056_v29 }
 0xd58   :  { %v1060_v31 = vmax.f32 %v1057_v30, 0.0 }
 0xd5a   :  { %v1063_v32 = vpack.c.bf16 %v1060_v31, %v1060_v31 }
 0xd5c   :  { %v1073_v33 = vsel %vm607_vm5, %v1063_v32, 0 }
 0xd5d   :  { %v1058_v35 = vpop.f32.mrf.mxu3  ;;  %1082 = vmatpush.bf16.msrb.mxu2 %v1073_v33 }
 0xd60   :  { %1529 = vmatmul.msk.bf16.vlgmr.msrb.gmra.mxu2 %vm603_vm6, %v1619_v34 }
 0xde3   :  { %v1084_v37 = vpop.f32.mrf.mxu2 }
 0xdeb   :  { %v1086_v38 = vpop.f32.mrf.mxu2 }
 0xdec   :  { %v1089_v39 = vpack.c.bf16 %v1086_v38, %v1084_v37 }
 0xdee   :  { %1534 = vmatmul.msk.bf16.vlgmr.msra.gmra.mxu0 %vm74_vm1, %v1089_v39 }
 0xe6b   :  { %v1110_v40 = vpop.f32.mrf.mxu0 }
 0xe6c   :  { %1121 = vst.msk [vmem:[#allocation2 + $0x8] sm:$0xff] %vm139_vm2, %v1110_v40 }
 0xe73   :  { %v1112_v41 = vpop.f32.mrf.mxu0  ;;  %v1123_v45 = vld [vmem:[#allocation2 + $0x7] sm:$0xff] }
 0xe74   :  { %1122 = vst.msk [vmem:[#allocation2 + $0x10] sm:$0xff] %vm139_vm2, %v1112_v41  ;;  %v1127_v52 = vmul.f32 %v1125_v43, %v1123_v45 }
 0xe7b   :  { %v1129_v47 = vld [vmem:[#allocation2 + $0x9] sm:$0xff]  ;;  %v1130_v48 = vld [vmem:[#allocation2 + $0x11] sm:$0xff] }
 0xe7c   :  { %v1124_v49 = vld [vmem:[#allocation2 + $0xf] sm:$0xff]  ;;  %v1133_v50 = vmul.f32 %v1131_v42, %v1129_v47  ;;  %v1134_v51 = vmul.f32 %v1132_v44, %v1130_v48 }
 0xe7d   :  { %v1128_v53 = vmul.f32 %v1126_v46, %v1124_v49 }
 0xe7e   :  { %v1676_v54 = vpack.i.bf16 %v1134_v51, %v1133_v50 }
 0xe7f   :  { %v1671_v55 = vpack.i.bf16 %v1128_v53, %v1127_v52 }
 0xe80   :  { %1677 = vrot.lane.b32.xlu2 %v1676_v54, %s1795_s20 }
 0xe81   :  { %1672 = vrot.lane.b32.xlu1 %v1671_v55, %s1803_s29 }
 0xeda   :  { %v1678_v62 = vpop.permute.xlu2 %1677 }
 0xedb   :  { %v1680_v4 = vunpack.i.h.bf16 %v1678_v62  ;;  %v1679_v3 = vunpack.i.l.bf16 %v1678_v62 }
 0xef3   :  { %v1673_v63 = vpop.permute.xlu1 %1672 }
 0xef4   :  { %v1675_v1 = vunpack.i.h.bf16 %v1673_v63  ;;  %v1674_v2 = vunpack.i.l.bf16 %v1673_v63 }
 0xef6   :  { %v1152_v5 = vsel %vm139_vm2, %v1112_v41, %v1675_v1  ;;  %v1151_v6 = vsel %vm139_vm2, %v1110_v40, %v1674_v2 }
 0xef7   :  { %v1154_v7 = vsel %vm67_vm0, %v1152_v5, %v1680_v4  ;;  %v1153_v8 = vsel %vm67_vm0, %v1151_v6, %v1679_v3 }
 0xef8   :  { %v1155_v9 = vpack.c.bf16 %v1154_v7, %v1153_v8 }
 0xefa   :  { %1559 = vmatmul.msk.bf16.vlgmr.msrb.gmra.mxu1 %vm397_vm4, %v1155_v9 }
 0xf77   :  { %v1218_v10 = vpop.f32.mrf.mxu1 }
 0xf78   :  { %v1219_v12 = vadd.f32 %v1687_v11, %v1218_v10 }
 0xf7a   :  { %v1223_v15 = vmax.f32 %v1219_v12, 0.0 }
 0xf7f   :  { %v1220_v13 = vpop.f32.mrf.mxu1 }
 0xf80   :  { %v1221_v14 = vadd.f32 %v1687_v11, %v1220_v13 }
 0xf82   :  { %v1224_v16 = vmax.f32 %v1221_v14, 0.0 }
 0xf84   :  { %v1229_v17 = vpack.c.bf16 %v1224_v16, %v1223_v15 }
 0xf86   :  { %1253 = vmatpush.bf16.msra.mxu2 %v1229_v17 }
 0xf89   :  { %1568 = vmatmul.msk.bf16.vlgmr.msra.gmra.mxu2 %vm74_vm1, %v1627_v18 }
 0xf99   :  { %1569 = vmatmul.msk.bf16.gmra.mxu2 %vm74_vm1, %v1628_v19 }
0x100c   :  { %v1255_v22 = vpop.f32.mrf.mxu2 }
0x1014   :  { %v1257_v23 = vpop.f32.mrf.mxu2 }
0x1015   :  { %v1265_v24 = vpack.c.bf16 %v1257_v23, %v1255_v22 }
0x1017   :  { %1570 = vmatmul.msk.bf16.vlgmr.msra.gmra.mxu3 %vm603_vm6, %v1265_v24 }
0x101c   :  { %v1260_v25 = vpop.f32.mrf.mxu2 }
0x1024   :  { %v1262_v26 = vpop.f32.mrf.mxu2 }
0x1025   :  { %v1266_v0 = vpack.c.bf16 %v1262_v26, %v1260_v25 }
0x1027   :  { %1571 = vmatmul.msk.bf16.gmra.mxu3 %vm603_vm6, %v1266_v0 }
0x109a   :  { %v1286_v27 = vpop.f32.mrf.mxu3 }
0x109b   :  { %1296 = vst.msk [vmem:[#allocation9] sm:$0xff] %vm74_vm1, %v1286_v27 }
0x10a2   :  { %v1288_v28 = vpop.f32.mrf.mxu3 }
0x10a3   :  { %1297 = vst.msk [vmem:[#allocation9 + $0x8] sm:$0xff] %vm74_vm1, %v1288_v28 }
0x10aa   :  { %v1291_v29 = vpop.f32.mrf.mxu3 }
0x10ab   :  { %1298 = vst.msk [vmem:[#allocation9 + $0x10] sm:$0xff] %vm74_vm1, %v1291_v29 }
0x10b2   :  { %v1293_v30 = vpop.f32.mrf.mxu3 }
0x10b3   :  { %1299 = vst.msk [vmem:[#allocation9 + $0x18] sm:$0xff] %vm74_vm1, %v1293_v30 }
0x10b4   :  { %1312 = dma.vmem_to_hbm [thread:$0]  %s1305_s5, 512, %s1307_s8, [#allocation5], %s1798_s24, %s1798_s24, %s1799_s1  }
0x10b5   :  { %1792 = dma.done.wait [#allocation5], 512  }
0x10b6   :  { %1793 = vsyncadd [#allocation5], 4294966784 }
0x10b7   :  { %1317 = vsyncpa [#allocation4], 1 }
0x10b8   :  { %1318 = vsyncpa [#allocation7], 1 }
0x10b9   :  { %1319 = vsyncpa [#allocation5], 1 }

</bundles_post_ra>
